<compile_context>
chip_gen: v7x
topology: tpu7x:2x2x1
jax: 0.10.0
libtpu: 0.0.40
codegen_flags: <defaults>
</compile_context>

<pallas_src>
import functools
import math

import jax
import jax.numpy as jnp
from jax.experimental import pallas as pl
from jax.experimental.pallas import tpu as pltpu

# Matmul inputs ride the MXU in bf16 (f32 accumulation everywhere); softmax
# denominator uses the approximate EUP reciprocal.  For bit-level validation
# against an fp32 PyTorch reference set _MM_DTYPE=jnp.float32 and
# _APPROX_RECIP=False.
_MM_DTYPE = jnp.bfloat16
_APPROX_RECIP = True

CFG = dict(vocab=128, hidden=32, layers=2, heads=2, intermediate=64,
           max_pos=64, type_vocab=2, ln_eps=1e-12)


# ----------------------------------------------------------------------------
# In-kernel helpers (traced inside Pallas kernels; f32 math only)
# ----------------------------------------------------------------------------
def _layernorm_f32(x, g, b, eps):
    mu = jnp.mean(x, axis=-1, keepdims=True)
    var = jnp.mean(jnp.square(x - mu), axis=-1, keepdims=True)  # biased, like torch
    return (x - mu) * jax.lax.rsqrt(var + eps) * g + b


def _gelu_erf(x):
    # Exact erf-GELU.  erf() has no guaranteed Mosaic lowering, so erf is
    # evaluated with the Abramowitz & Stegun 7.1.26 polynomial
    # (|err| < 1.5e-7), using only exp / VPU ops that lower cleanly.
    u = x * 0.7071067811865476
    au = jnp.abs(u)
    t = 1.0 / (1.0 + 0.3275911 * au)
    poly = ((((1.061405429 * t - 1.453152027) * t + 1.421413741) * t
             - 0.284496736) * t + 0.254829592) * t
    erf_abs = 1.0 - poly * jnp.exp(-au * au)
    erf_u = jnp.where(u >= 0.0, erf_abs, -erf_abs)
    return 0.5 * x * (1.0 + erf_u)


# ----------------------------------------------------------------------------
# Fused encoder layer kernel
#   [optional embed-LN] + QKV (one matmul) + per-head attention + output
#   projection (one matmul) + residual + LN + FFN w1 + erf-GELU + FFN w2
#   + residual + LN, gridded over batch.
# ----------------------------------------------------------------------------
def _encoder_layer_kernel(*refs, heads, head_dim, eps, input_ln):
    if input_ln:
        (x_ref, m_ref, g0_ref, b0_ref,
         wqkv_ref, bqkv_ref, wo_ref, bo_ref,
         g1_ref, bln1_ref, w1_ref, b1_ref, w2_ref, b2_ref,
         g2_ref, bln2_ref, o_ref) = refs
    else:
        (x_ref, m_ref,
         wqkv_ref, bqkv_ref, wo_ref, bo_ref,
         g1_ref, bln1_ref, w1_ref, b1_ref, w2_ref, b2_ref,
         g2_ref, bln2_ref, o_ref) = refs

    cd = _MM_DTYPE
    x = x_ref[...].astype(jnp.float32)           # (S, D) residual base, f32
    if input_ln:
        # First layer: embedding LayerNorm fused in (BERT encoder input).
        x = _layernorm_f32(x, g0_ref[...], b0_ref[...], eps)
    xc = x.astype(cd)
    mask = m_ref[...].reshape(1, -1)             # (1, S) additive key mask, f32
    S, D = x.shape

    # --- fused QKV projection: ONE full-width (S, 3D) matmul ---------------
    # wqkv: [D, 3D] packed [q | k | v]; 1/sqrt(Dh) folded into the q columns.
    qkv = jnp.dot(xc, wqkv_ref[...],
                  preferred_element_type=jnp.float32) + bqkv_ref[...]
    q_all = qkv[:, :D]
    k_all = qkv[:, D:2 * D]
    v_all = qkv[:, 2 * D:]

    # --- per-head attention -------------------------------------------------
    # TODO(synk): at real H=12 / Dh=64 switch this static unroll to a
    # lax.fori_loop over head *pairs* (128-lane aligned slices) writing ctx
    # into a (S, D) VMEM scratch, to bound vreg live ranges.
    ctx_heads = []
    for h in range(heads):
        lo = h * head_dim
        q = q_all[:, lo:lo + head_dim]
        k = k_all[:, lo:lo + head_dim]
        v = v_all[:, lo:lo + head_dim]
        # scores = q @ k^T  (scale already folded into wqkv's q columns)
        s = jax.lax.dot_general(q.astype(cd), k.astype(cd),
                                (((1,), (1,)), ((), ())),
                                preferred_element_type=jnp.float32)   # (S, S)
        s = s + mask
        smax = jnp.max(s, axis=-1, keepdims=True)
        p = jnp.exp(s - smax)
        denom = jnp.sum(p, axis=-1, keepdims=True)
        p = p * pl.reciprocal(denom, approx=_APPROX_RECIP)
        ctx_heads.append(jnp.dot(p.astype(cd), v.astype(cd),
                                 preferred_element_type=jnp.float32))  # (S, Dh)
    ctx = jnp.concatenate(ctx_heads, axis=-1)    # (S, D) head concat (lanes)

    # --- output projection: ONE (S, D) @ (D, D) matmul ----------------------
    attn = jnp.dot(ctx.astype(cd), wo_ref[...],
                   preferred_element_type=jnp.float32) + bo_ref[...]
    h1 = _layernorm_f32(attn + x, g1_ref[...], bln1_ref[...], eps)

    # --- feed-forward: w1 + exact erf-GELU + w2, fused with residual + LN ---
    # TODO(synk): at bert-base (S=512, I=3072) tile the S axis here (~128-row
    # chunks) so the GELU VALU/EUP work overlaps neighbouring chunks' MXU work
    # and the (S, I) f32 intermediate shrinks (v7x 64 MiB VMEM).
    inter = jnp.dot(h1.astype(cd), w1_ref[...],
                    preferred_element_type=jnp.float32) + b1_ref[...]
    inter = _gelu_erf(inter)
    ffn = jnp.dot(inter.astype(cd), w2_ref[...],
                  preferred_element_type=jnp.float32) + b2_ref[...]
    o_ref[...] = _layernorm_f32(ffn + h1, g2_ref[...], bln2_ref[...],
                                eps).astype(o_ref.dtype)


def encoder_layer(x, addmask, lyr, *, B, S, D, H, I, eps, input_ln_params=None):
    input_ln = input_ln_params is not None

    in_specs = [
        pl.BlockSpec((S, D), lambda b: (b, 0)),       # x (per-batch slab)
        pl.BlockSpec((1, 1, S), lambda b: (b, 0, 0)),  # additive mask
    ]
    args = [x, addmask]
    if input_ln:
        in_specs += [pl.BlockSpec((1, D), lambda b: (0, 0)),   # embed LN gamma
                     pl.BlockSpec((1, D), lambda b: (0, 0))]   # embed LN beta
        args += list(input_ln_params)

    # Weights: constant index maps -> resident across the batch grid.
    # TODO(synk): at real sizes mark these pipeline_mode=pl.Buffered(1) so the
    # ~14 MB/layer of never-changing weights is not double-buffered (v7x 64 MiB).
    in_specs += [
        pl.BlockSpec((D, 3 * D), lambda b: (0, 0)),   # packed wqkv (bf16)
        pl.BlockSpec((1, 3 * D), lambda b: (0, 0)),   # packed bqkv (f32)
        pl.BlockSpec((D, D), lambda b: (0, 0)),       # wo (bf16)
        pl.BlockSpec((1, D), lambda b: (0, 0)),       # bo
        pl.BlockSpec((1, D), lambda b: (0, 0)),       # attn LN gamma
        pl.BlockSpec((1, D), lambda b: (0, 0)),       # attn LN beta
        pl.BlockSpec((D, I), lambda b: (0, 0)),       # w1 (bf16)
        pl.BlockSpec((1, I), lambda b: (0, 0)),       # b1
        pl.BlockSpec((I, D), lambda b: (0, 0)),       # w2 (bf16)
        pl.BlockSpec((1, D), lambda b: (0, 0)),       # b2
        pl.BlockSpec((1, D), lambda b: (0, 0)),       # ffn LN gamma
        pl.BlockSpec((1, D), lambda b: (0, 0)),       # ffn LN beta
    ]
    args += [lyr['wqkv'], lyr['bqkv'], lyr['wo'], lyr['bo'],
             lyr['ln1_g'], lyr['ln1_b'], lyr['w1'], lyr['b1'],
             lyr['w2'], lyr['b2'], lyr['ln2_g'], lyr['ln2_b']]

    # TODO(synk): at bert-base add an S-tile grid axis (also "parallel") so
    # each v7x core sees >=2 grid steps even at small batch.
    return pl.pallas_call(
        functools.partial(_encoder_layer_kernel, heads=H, head_dim=D // H,
                          eps=eps, input_ln=input_ln),
        out_shape=jax.ShapeDtypeStruct((B * S, D), jnp.float32),
        grid=(B,),
        in_specs=in_specs,
        out_specs=pl.BlockSpec((S, D), lambda b: (b, 0)),
        compiler_params=pltpu.CompilerParams(
            dimension_semantics=("parallel",),
            vmem_limit_bytes=48 << 20),   # raise v5e's 16 MiB default scoped VMEM
    )(*args)


# ----------------------------------------------------------------------------
# Tied LM head + LogSoftmax kernel
# ----------------------------------------------------------------------------
def _lm_head_logsoftmax_kernel(h_ref, we_ref, b_ref, o_ref):
    cd = _MM_DTYPE
    # logits = h @ word_emb^T + bias ; word_emb is passed as [V, D] and
    # contracted on D (MXU consumes a transposed RHS natively, no HBM .T copy)
    logits = jax.lax.dot_general(h_ref[...].astype(cd), we_ref[...],
                                 (((1,), (1,)), ((), ())),
                                 preferred_element_type=jnp.float32) + b_ref[...]
    m = jnp.max(logits, axis=-1, keepdims=True)
    z = logits - m
    lse = jnp.log(jnp.sum(jnp.exp(z), axis=-1, keepdims=True))
    o_ref[...] = (z - lse).astype(o_ref.dtype)


def lm_head_logsoftmax(h, word_emb_mm, bias):
    M, D = h.shape
    V = word_emb_mm.shape[0]
    # Whole-M row tile at toy size (M=16).
    # TODO(synk): for real bert-base-chinese (V~21128, M=B*512) cap TM at
    # ~256-512 rows and tile the V axis ("arbitrary", Vt multiple of 128) with
    # online max/log-sum-exp scratch -- the untiled bf16 [V, D] block
    # double-buffered (~62 MB) does not fit v7x's 64 MiB VMEM.
    TM = M
    return pl.pallas_call(
        _lm_head_logsoftmax_kernel,
        out_shape=jax.ShapeDtypeStruct((M, V), jnp.float32),
        grid=(M // TM,),
        in_specs=[pl.BlockSpec((TM, D), lambda i: (i, 0)),
                  pl.BlockSpec((V, D), lambda i: (0, 0)),
                  pl.BlockSpec((1, V), lambda i: (0, 0))],
        out_specs=pl.BlockSpec((TM, V), lambda i: (i, 0)),   # lane-dense
        compiler_params=pltpu.CompilerParams(
            dimension_semantics=("parallel",),
            vmem_limit_bytes=48 << 20),
    )(h, word_emb_mm, bias)


# ----------------------------------------------------------------------------
# Parameters (deterministic synthetic init — no checkpoint)
# ----------------------------------------------------------------------------
def init_params(key, cfg):
    D, V, I = cfg['hidden'], cfg['vocab'], cfg['intermediate']
    keys = iter(jax.random.split(key, 128))

    def nrm(shape, std=0.02):
        return std * jax.random.normal(next(keys), shape, jnp.float32)

    params = dict(
        word_emb=nrm((V, D)),
        pos_emb=nrm((cfg['max_pos'], D)),
        type_emb=nrm((cfg['type_vocab'], D)),
        emb_ln_g=jnp.ones((D,), jnp.float32),
        emb_ln_b=jnp.zeros((D,), jnp.float32),
        out_bias=nrm((V,)),              # nn.Linear bias (weight tied to word_emb)
        layers=[],
    )
    for _ in range(cfg['layers']):
        params['layers'].append(dict(
            wq=nrm((D, D)), bq=jnp.zeros((D,), jnp.float32),
            wk=nrm((D, D)), bk=jnp.zeros((D,), jnp.float32),
            wv=nrm((D, D)), bv=jnp.zeros((D,), jnp.float32),
            wo=nrm((D, D)), bo=jnp.zeros((D,), jnp.float32),
            attn_ln_g=jnp.ones((D,), jnp.float32),
            attn_ln_b=jnp.zeros((D,), jnp.float32),
            w1=nrm((D, I)), b1=jnp.zeros((I,), jnp.float32),
            w2=nrm((I, D)), b2=jnp.zeros((D,), jnp.float32),
            ffn_ln_g=jnp.ones((D,), jnp.float32),
            ffn_ln_b=jnp.zeros((D,), jnp.float32),
        ))
    return params


def prepare_fused_params(raw, cfg):
    """One-time packing: fuse QKV weights into [D, 3D], fold 1/sqrt(Dh) into
    the q columns, cast matmul weights to bf16.  Done once, outside forward."""
    D, H, I = cfg['hidden'], cfg['heads'], cfg['intermediate']
    Dh = D // H
    scale = 1.0 / math.sqrt(Dh)
    cd = _MM_DTYPE

    fp = dict(
        word_emb=raw['word_emb'],                       # f32, for the gather
        word_emb_mm=raw['word_emb'].astype(cd),         # bf16 tied LM-head weight
        pos_emb=raw['pos_emb'],
        type_emb=raw['type_emb'],
        emb_ln_g=raw['emb_ln_g'].reshape(1, D),
        emb_ln_b=raw['emb_ln_b'].reshape(1, D),
        out_bias=raw['out_bias'].reshape(1, -1),
        layers=[],
    )
    for lyr in raw['layers']:
        wqkv = jnp.concatenate([lyr['wq'] * scale, lyr['wk'], lyr['wv']],
                               axis=1).astype(cd)                       # [D, 3D]
        bqkv = jnp.concatenate([lyr['bq'] * scale, lyr['bk'], lyr['bv']]
                               ).reshape(1, 3 * D)                      # [1, 3D]
        fp['layers'].append(dict(
            wqkv=wqkv, bqkv=bqkv,
            wo=lyr['wo'].astype(cd),                    # [D, D] full-width
            bo=lyr['bo'].reshape(1, D),
            ln1_g=lyr['attn_ln_g'].reshape(1, D),
            ln1_b=lyr['attn_ln_b'].reshape(1, D),
            w1=lyr['w1'].astype(cd), b1=lyr['b1'].reshape(1, I),
            w2=lyr['w2'].astype(cd), b2=lyr['b2'].reshape(1, D),
            ln2_g=lyr['ffn_ln_g'].reshape(1, D),
            ln2_b=lyr['ffn_ln_b'].reshape(1, D),
        ))
    return fp


# ----------------------------------------------------------------------------
# BertFineTune.forward
# ----------------------------------------------------------------------------
def bert_finetune_forward(fp, input_ids, input_tyi, input_attn_mask):
    cfg = CFG
    B, S = input_ids.shape
    D, V = cfg['hidden'], cfg['vocab']
    H, I = cfg['heads'], cfg['intermediate']
    eps = cfg['ln_eps']

    # --- BERT embeddings: gathers are glue; the embedding LayerNorm is fused
    #     into the first encoder-layer kernel below. ---
    pos_ids = jnp.arange(S)
    x = (jnp.take(fp['word_emb'], input_ids, axis=0)
         + jnp.take(fp['pos_emb'], pos_ids, axis=0)[None, :, :]
         + jnp.take(fp['type_emb'], input_tyi, axis=0)).reshape(B * S, D)

    # HF extended attention mask: (1 - mask) * finfo(float32).min, additive.
    addmask = ((1.0 - input_attn_mask.astype(jnp.float32))
               * jnp.finfo(jnp.float32).min).reshape(B, 1, S)

    # --- encoder: one fused Pallas kernel per layer ---
    for li, lyr in enumerate(fp['layers']):
        x = encoder_layer(
            x, addmask, lyr, B=B, S=S, D=D, H=H, I=I, eps=eps,
            input_ln_params=((fp['emb_ln_g'], fp['emb_ln_b'])
                             if li == 0 else None))

    # --- tied LM head: logits = h @ word_emb^T + bias; LogSoftmax(dim=-1) ---
    logp = lm_head_logsoftmax(x, fp['word_emb_mm'], fp['out_bias'])
    return logp.reshape(B, S, V)


# ----------------------------------------------------------------------------
if __name__ == "__main__":
    assert CFG['hidden'] % CFG['heads'] == 0

    key = jax.random.PRNGKey(0)
    k_param, k_ids, k_tyi = jax.random.split(key, 3)

    B, S = 2, 8
    raw_params = init_params(k_param, CFG)
    fused_params = prepare_fused_params(raw_params, CFG)

    input_ids = jax.random.randint(k_ids, (B, S), 0, CFG['vocab'], dtype=jnp.int32)
    input_tyi = jnp.concatenate(
        [jnp.zeros((B, S // 2), jnp.int32), jnp.ones((B, S // 2), jnp.int32)], axis=1)
    # second sequence has 2 padding positions at the end
    input_attn_mask = jnp.array(
        [[1, 1, 1, 1, 1, 1, 1, 1],
         [1, 1, 1, 1, 1, 1, 0, 0]], dtype=jnp.int32)

    fwd = jax.jit(bert_finetune_forward)
    out = fwd(fused_params, input_ids, input_tyi, input_attn_mask)
    out = jax.block_until_ready(out)

    assert out.shape == (B, S, CFG['vocab']), out.shape
    assert out.dtype == jnp.float32
    assert bool(jnp.all(jnp.isfinite(out)))
    # each row of log-probs must sum (in prob space) to ~1
    prob_sums = jnp.exp(out).sum(-1)
    assert bool(jnp.allclose(prob_sums, 1.0, atol=1e-4))

    print("KERNEL_OK")
</pallas_src>

<mosaic_0001>
module attributes {stable_mosaic.version = 11 : i64} {
  func.func @_lm_head_logsoftmax_kernel(%arg0: i32, %arg1: memref<16x32xf32, #tpu.memory_space<vmem>>, %arg2: memref<128x32xbf16, #tpu.memory_space<vmem>>, %arg3: memref<1x128xf32, #tpu.memory_space<vmem>>, %arg4: memref<16x128xf32, #tpu.memory_space<vmem>>) attributes {dimension_semantics = [#tpu.dimension_semantics<parallel>], iteration_bounds = array<i64: 1>, scalar_prefetch = 0 : i64, scratch_operands = 0 : i64, tpu.core_type = #tpu.core_type<tc>, window_params = [{transform_indices = @transform_0, window_bounds = array<i64: 16, 32>}, {pipeline_mode = #tpu.pipeline_mode<synchronous>, transform_indices = @transform_1, window_bounds = array<i64: 128, 32>}, {pipeline_mode = #tpu.pipeline_mode<synchronous>, transform_indices = @transform_2, window_bounds = array<i64: 1, 128>}, {transform_indices = @transform_3, window_bounds = array<i64: 16, 128>}]} {
    %c0 = arith.constant 0 : index
    %c0_0 = arith.constant 0 : index
    %0 = vector.load %arg1[%c0, %c0_0] : memref<16x32xf32, #tpu.memory_space<vmem>>, vector<16x32xf32>
    %1 = arith.truncf %0 : vector<16x32xf32> to vector<16x32xbf16>
    %c0_1 = arith.constant 0 : index
    %c0_2 = arith.constant 0 : index
    %2 = vector.load %arg2[%c0_1, %c0_2] : memref<128x32xbf16, #tpu.memory_space<vmem>>, vector<128x32xbf16>
    %cst = arith.constant dense<0.000000e+00> : vector<16x128xf32>
    %3 = tpu.matmul %1, %2, %cst {dimension_numbers = #tpu.dot_dimension_numbers<[1], [1], [0], [0], [0, 0, 1, 0], [], []>} : vector<16x32xbf16>, vector<128x32xbf16>, vector<16x128xf32> -> vector<16x128xf32>
    %c0_3 = arith.constant 0 : index
    %c0_4 = arith.constant 0 : index
    %4 = vector.load %arg3[%c0_3, %c0_4] : memref<1x128xf32, #tpu.memory_space<vmem>>, vector<1x128xf32>
    %5 = vector.broadcast %4 : vector<1x128xf32> to vector<16x128xf32>
    %6 = arith.addf %3, %5 : vector<16x128xf32>
    %cst_5 = arith.constant dense<0xFF800000> : vector<16xf32>
    %7 = vector.multi_reduction <maximumf>, %6, %cst_5 [1] : vector<16x128xf32> to vector<16xf32>
    %8 = vector.shape_cast %7 : vector<16xf32> to vector<16x1xf32>
    %9 = vector.broadcast %8 : vector<16x1xf32> to vector<16x128xf32>
    %10 = arith.subf %6, %9 : vector<16x128xf32>
    %11 = math.exp %10 : vector<16x128xf32>
    %cst_6 = arith.constant dense<0.000000e+00> : vector<16xf32>
    %12 = vector.multi_reduction <add>, %11, %cst_6 [1] : vector<16x128xf32> to vector<16xf32>
    %13 = vector.shape_cast %12 : vector<16xf32> to vector<16x1xf32>
    %14 = math.log %13 : vector<16x1xf32>
    %15 = vector.broadcast %14 : vector<16x1xf32> to vector<16x128xf32>
    %16 = arith.subf %10, %15 : vector<16x128xf32>
    %c0_7 = arith.constant 0 : index
    %c0_8 = arith.constant 0 : index
    %17 = vector.load %arg4[%c0_7, %c0_8] : memref<16x128xf32, #tpu.memory_space<vmem>>, vector<16x128xf32>
    tpu.vector_store %arg4[%c0_7, %c0_8], %16 {strides = array<i32>} : memref<16x128xf32, #tpu.memory_space<vmem>>, vector<16x128xf32>,
    return
  }
  func.func @transform_0(%arg0: i32) -> (i32, i32) {
    %c0_i32 = arith.constant 0 : i32
    %c0_i32_0 = arith.constant 0 : i32
    return %arg0, %c0_i32 : i32, i32
  }
  func.func @transform_1(%arg0: i32) -> (i32, i32) {
    %c0_i32 = arith.constant 0 : i32
    %c0_i32_0 = arith.constant 0 : i32
    %c0_i32_1 = arith.constant 0 : i32
    return %c0_i32, %c0_i32_0 : i32, i32
  }
  func.func @transform_2(%arg0: i32) -> (i32, i32) {
    %c0_i32 = arith.constant 0 : i32
    %c0_i32_0 = arith.constant 0 : i32
    %c0_i32_1 = arith.constant 0 : i32
    return %c0_i32, %c0_i32_0 : i32, i32
  }
  func.func @transform_3(%arg0: i32) -> (i32, i32) {
    %c0_i32 = arith.constant 0 : i32
    %c0_i32_0 = arith.constant 0 : i32
    return %arg0, %c0_i32 : i32, i32
  }
}

module attributes {stable_mosaic.version = 11 : i64} {
  func.func @_encoder_layer_kernel(%arg0: i32, %arg1: memref<8x32xf32, #tpu.memory_space<vmem>>, %arg2: memref<1x1x8xf32, #tpu.memory_space<vmem>>, %arg3: memref<32x96xbf16, #tpu.memory_space<vmem>>, %arg4: memref<1x96xf32, #tpu.memory_space<vmem>>, %arg5: memref<32x32xbf16, #tpu.memory_space<vmem>>, %arg6: memref<1x32xf32, #tpu.memory_space<vmem>>, %arg7: memref<1x32xf32, #tpu.memory_space<vmem>>, %arg8: memref<1x32xf32, #tpu.memory_space<vmem>>, %arg9: memref<32x64xbf16, #tpu.memory_space<vmem>>, %arg10: memref<1x64xf32, #tpu.memory_space<vmem>>, %arg11: memref<64x32xbf16, #tpu.memory_space<vmem>>, %arg12: memref<1x32xf32, #tpu.memory_space<vmem>>, %arg13: memref<1x32xf32, #tpu.memory_space<vmem>>, %arg14: memref<1x32xf32, #tpu.memory_space<vmem>>, %arg15: memref<8x32xf32, #tpu.memory_space<vmem>>) attributes {dimension_semantics = [#tpu.dimension_semantics<parallel>], iteration_bounds = array<i64: 2>, scalar_prefetch = 0 : i64, scratch_operands = 0 : i64, tpu.core_type = #tpu.core_type<tc>, window_params = [{transform_indices = @transform_0, window_bounds = array<i64: 8, 32>}, {transform_indices = @transform_1, window_bounds = array<i64: 1, 1, 8>}, {pipeline_mode = #tpu.pipeline_mode<synchronous>, transform_indices = @transform_2, window_bounds = array<i64: 32, 96>}, {pipeline_mode = #tpu.pipeline_mode<synchronous>, transform_indices = @transform_3, window_bounds = array<i64: 1, 96>}, {pipeline_mode = #tpu.pipeline_mode<synchronous>, transform_indices = @transform_4, window_bounds = array<i64: 32, 32>}, {pipeline_mode = #tpu.pipeline_mode<synchronous>, transform_indices = @transform_5, window_bounds = array<i64: 1, 32>}, {pipeline_mode = #tpu.pipeline_mode<synchronous>, transform_indices = @transform_6, window_bounds = array<i64: 1, 32>}, {pipeline_mode = #tpu.pipeline_mode<synchronous>, transform_indices = @transform_7, window_bounds = array<i64: 1, 32>}, {pipeline_mode = #tpu.pipeline_mode<synchronous>, transform_indices = @transform_8, window_bounds = array<i64: 32, 64>}, {pipeline_mode = #tpu.pipeline_mode<synchronous>, transform_indices = @transform_9, window_bounds = array<i64: 1, 64>}, {pipeline_mode = #tpu.pipeline_mode<synchronous>, transform_indices = @transform_10, window_bounds = array<i64: 64, 32>}, {pipeline_mode = #tpu.pipeline_mode<synchronous>, transform_indices = @transform_11, window_bounds = array<i64: 1, 32>}, {pipeline_mode = #tpu.pipeline_mode<synchronous>, transform_indices = @transform_12, window_bounds = array<i64: 1, 32>}, {pipeline_mode = #tpu.pipeline_mode<synchronous>, transform_indices = @transform_13, window_bounds = array<i64: 1, 32>}, {transform_indices = @transform_14, window_bounds = array<i64: 8, 32>}]} {
    %c0 = arith.constant 0 : index
    %c0_0 = arith.constant 0 : index
    %0 = vector.load %arg1[%c0, %c0_0] : memref<8x32xf32, #tpu.memory_space<vmem>>, vector<8x32xf32>
    %1 = arith.truncf %0 : vector<8x32xf32> to vector<8x32xbf16>
    %c0_1 = arith.constant 0 : index
    %c0_2 = arith.constant 0 : index
    %c0_3 = arith.constant 0 : index
    %2 = vector.load %arg2[%c0_1, %c0_2, %c0_3] : memref<1x1x8xf32, #tpu.memory_space<vmem>>, vector<1x1x8xf32>
    %3 = vector.shape_cast %2 : vector<1x1x8xf32> to vector<1x8xf32>
    %c0_4 = arith.constant 0 : index
    %c0_5 = arith.constant 0 : index
    %4 = vector.load %arg3[%c0_4, %c0_5] : memref<32x96xbf16, #tpu.memory_space<vmem>>, vector<32x96xbf16>
    %cst = arith.constant dense<0.000000e+00> : vector<8x96xf32>
    %5 = tpu.matmul %1, %4, %cst {dimension_numbers = #tpu.dot_dimension_numbers<[1], [0], [0], [1], [0, 0, 1, 1], [], []>} : vector<8x32xbf16>, vector<32x96xbf16>, vector<8x96xf32> -> vector<8x96xf32>
    %c0_6 = arith.constant 0 : index
    %c0_7 = arith.constant 0 : index
    %6 = vector.load %arg4[%c0_6, %c0_7] : memref<1x96xf32, #tpu.memory_space<vmem>>, vector<1x96xf32>
    %7 = vector.broadcast %6 : vector<1x96xf32> to vector<8x96xf32>
    %8 = arith.addf %5, %7 : vector<8x96xf32>
    %9 = vector.extract_strided_slice %8 {offsets = [0, 0], sizes = [8, 32], strides = [1, 1]} : vector<8x96xf32> to vector<8x32xf32>
    %10 = vector.extract_strided_slice %8 {offsets = [0, 32], sizes = [8, 32], strides = [1, 1]} : vector<8x96xf32> to vector<8x32xf32>
    %11 = vector.extract_strided_slice %8 {offsets = [0, 64], sizes = [8, 32], strides = [1, 1]} : vector<8x96xf32> to vector<8x32xf32>
    %12 = vector.extract_strided_slice %9 {offsets = [0, 0], sizes = [8, 16], strides = [1, 1]} : vector<8x32xf32> to vector<8x16xf32>
    %13 = vector.extract_strided_slice %10 {offsets = [0, 0], sizes = [8, 16], strides = [1, 1]} : vector<8x32xf32> to vector<8x16xf32>
    %14 = vector.extract_strided_slice %11 {offsets = [0, 0], sizes = [8, 16], strides = [1, 1]} : vector<8x32xf32> to vector<8x16xf32>
    %15 = arith.truncf %12 : vector<8x16xf32> to vector<8x16xbf16>
    %16 = arith.truncf %13 : vector<8x16xf32> to vector<8x16xbf16>
    %cst_8 = arith.constant dense<0.000000e+00> : vector<8x8xf32>
    %17 = tpu.matmul %15, %16, %cst_8 {dimension_numbers = #tpu.dot_dimension_numbers<[1], [1], [0], [0], [0, 0, 1, 0], [], []>} : vector<8x16xbf16>, vector<8x16xbf16>, vector<8x8xf32> -> vector<8x8xf32>
    %18 = vector.broadcast %3 : vector<1x8xf32> to vector<8x8xf32>
    %19 = arith.addf %17, %18 : vector<8x8xf32>
    %cst_9 = arith.constant dense<0xFF800000> : vector<8xf32>
    %20 = vector.multi_reduction <maximumf>, %19, %cst_9 [1] : vector<8x8xf32> to vector<8xf32>
    %21 = vector.shape_cast %20 : vector<8xf32> to vector<8x1xf32>
    %22 = vector.broadcast %21 : vector<8x1xf32> to vector<8x8xf32>
    %23 = arith.subf %19, %22 : vector<8x8xf32>
    %24 = math.exp %23 : vector<8x8xf32>
    %cst_10 = arith.constant dense<0.000000e+00> : vector<8xf32>
    %25 = vector.multi_reduction <add>, %24, %cst_10 [1] : vector<8x8xf32> to vector<8xf32>
    %26 = vector.shape_cast %25 : vector<8xf32> to vector<8x1xf32>
    %27 = tpu.reciprocal %26 {approx = true} : vector<8x1xf32> -> vector<8x1xf32>
    %28 = vector.broadcast %27 : vector<8x1xf32> to vector<8x8xf32>
    %29 = arith.mulf %24, %28 : vector<8x8xf32>
    %30 = arith.truncf %29 : vector<8x8xf32> to vector<8x8xbf16>
    %31 = arith.truncf %14 : vector<8x16xf32> to vector<8x16xbf16>
    %cst_11 = arith.constant dense<0.000000e+00> : vector<8x16xf32>
    %32 = tpu.matmul %30, %31, %cst_11 {dimension_numbers = #tpu.dot_dimension_numbers<[1], [0], [0], [1], [0, 0, 1, 1], [], []>} : vector<8x8xbf16>, vector<8x16xbf16>, vector<8x16xf32> -> vector<8x16xf32>
    %33 = vector.extract_strided_slice %9 {offsets = [0, 16], sizes = [8, 16], strides = [1, 1]} : vector<8x32xf32> to vector<8x16xf32>
    %34 = vector.extract_strided_slice %10 {offsets = [0, 16], sizes = [8, 16], strides = [1, 1]} : vector<8x32xf32> to vector<8x16xf32>
    %35 = vector.extract_strided_slice %11 {offsets = [0, 16], sizes = [8, 16], strides = [1, 1]} : vector<8x32xf32> to vector<8x16xf32>
    %36 = arith.truncf %33 : vector<8x16xf32> to vector<8x16xbf16>
    %37 = arith.truncf %34 : vector<8x16xf32> to vector<8x16xbf16>
    %cst_12 = arith.constant dense<0.000000e+00> : vector<8x8xf32>
    %38 = tpu.matmul %36, %37, %cst_12 {dimension_numbers = #tpu.dot_dimension_numbers<[1], [1], [0], [0], [0, 0, 1, 0], [], []>} : vector<8x16xbf16>, vector<8x16xbf16>, vector<8x8xf32> -> vector<8x8xf32>
    %39 = vector.broadcast %3 : vector<1x8xf32> to vector<8x8xf32>
    %40 = arith.addf %38, %39 : vector<8x8xf32>
    %cst_13 = arith.constant dense<0xFF800000> : vector<8xf32>
    %41 = vector.multi_reduction <maximumf>, %40, %cst_13 [1] : vector<8x8xf32> to vector<8xf32>
    %42 = vector.shape_cast %41 : vector<8xf32> to vector<8x1xf32>
    %43 = vector.broadcast %42 : vector<8x1xf32> to vector<8x8xf32>
    %44 = arith.subf %40, %43 : vector<8x8xf32>
    %45 = math.exp %44 : vector<8x8xf32>
    %cst_14 = arith.constant dense<0.000000e+00> : vector<8xf32>
    %46 = vector.multi_reduction <add>, %45, %cst_14 [1] : vector<8x8xf32> to vector<8xf32>
    %47 = vector.shape_cast %46 : vector<8xf32> to vector<8x1xf32>
    %48 = tpu.reciprocal %47 {approx = true} : vector<8x1xf32> -> vector<8x1xf32>
    %49 = vector.broadcast %48 : vector<8x1xf32> to vector<8x8xf32>
    %50 = arith.mulf %45, %49 : vector<8x8xf32>
    %51 = arith.truncf %50 : vector<8x8xf32> to vector<8x8xbf16>
    %52 = arith.truncf %35 : vector<8x16xf32> to vector<8x16xbf16>
    %cst_15 = arith.constant dense<0.000000e+00> : vector<8x16xf32>
    %53 = tpu.matmul %51, %52, %cst_15 {dimension_numbers = #tpu.dot_dimension_numbers<[1], [0], [0], [1], [0, 0, 1, 1], [], []>} : vector<8x8xbf16>, vector<8x16xbf16>, vector<8x16xf32> -> vector<8x16xf32>
    %54 = tpu.concatenate %32, %53 in 1 : vector<8x16xf32>, vector<8x16xf32> -> vector<8x32xf32>
    %55 = arith.truncf %54 : vector<8x32xf32> to vector<8x32xbf16>
    %c0_16 = arith.constant 0 : index
    %c0_17 = arith.constant 0 : index
    %56 = vector.load %arg5[%c0_16, %c0_17] : memref<32x32xbf16, #tpu.memory_space<vmem>>, vector<32x32xbf16>
    %cst_18 = arith.constant dense<0.000000e+00> : vector<8x32xf32>
    %57 = tpu.matmul %55, %56, %cst_18 {dimension_numbers = #tpu.dot_dimension_numbers<[1], [0], [0], [1], [0, 0, 1, 1], [], []>} : vector<8x32xbf16>, vector<32x32xbf16>, vector<8x32xf32> -> vector<8x32xf32>
    %c0_19 = arith.constant 0 : index
    %c0_20 = arith.constant 0 : index
    %58 = vector.load %arg6[%c0_19, %c0_20] : memref<1x32xf32, #tpu.memory_space<vmem>>, vector<1x32xf32>
    %59 = vector.broadcast %58 : vector<1x32xf32> to vector<8x32xf32>
    %60 = arith.addf %57, %59 : vector<8x32xf32>
    %61 = arith.addf %60, %0 : vector<8x32xf32>
    %c0_21 = arith.constant 0 : index
    %c0_22 = arith.constant 0 : index
    %62 = vector.load %arg7[%c0_21, %c0_22] : memref<1x32xf32, #tpu.memory_space<vmem>>, vector<1x32xf32>
    %c0_23 = arith.constant 0 : index
    %c0_24 = arith.constant 0 : index
    %63 = vector.load %arg8[%c0_23, %c0_24] : memref<1x32xf32, #tpu.memory_space<vmem>>, vector<1x32xf32>
    %cst_25 = arith.constant dense<0.000000e+00> : vector<8xf32>
    %64 = vector.multi_reduction <add>, %61, %cst_25 [1] : vector<8x32xf32> to vector<8xf32>
    %65 = vector.shape_cast %64 : vector<8xf32> to vector<8x1xf32>
    %cst_26 = arith.constant 3.200000e+01 : f32
    %66 = vector.broadcast %cst_26 : f32 to vector<8x1xf32>
    %67 = arith.divf %65, %66 : vector<8x1xf32>
    %68 = vector.broadcast %67 : vector<8x1xf32> to vector<8x32xf32>
    %69 = arith.subf %61, %68 : vector<8x32xf32>
    %70 = arith.mulf %69, %69 : vector<8x32xf32>
    %cst_27 = arith.constant dense<0.000000e+00> : vector<8xf32>
    %71 = vector.multi_reduction <add>, %70, %cst_27 [1] : vector<8x32xf32> to vector<8xf32>
    %72 = vector.shape_cast %71 : vector<8xf32> to vector<8x1xf32>
    %cst_28 = arith.constant 3.200000e+01 : f32
    %73 = vector.broadcast %cst_28 : f32 to vector<8x1xf32>
    %74 = arith.divf %72, %73 : vector<8x1xf32>
    %75 = vector.broadcast %67 : vector<8x1xf32> to vector<8x32xf32>
    %76 = arith.subf %61, %75 : vector<8x32xf32>
    %cst_29 = arith.constant 9.99999996E-13 : f32
    %77 = vector.broadcast %cst_29 : f32 to vector<8x1xf32>
    %78 = arith.addf %74, %77 : vector<8x1xf32>
    %79 = math.rsqrt %78 : vector<8x1xf32>
    %80 = vector.broadcast %79 : vector<8x1xf32> to vector<8x32xf32>
    %81 = arith.mulf %76, %80 : vector<8x32xf32>
    %82 = vector.broadcast %62 : vector<1x32xf32> to vector<8x32xf32>
    %83 = arith.mulf %81, %82 : vector<8x32xf32>
    %84 = vector.broadcast %63 : vector<1x32xf32> to vector<8x32xf32>
    %85 = arith.addf %83, %84 : vector<8x32xf32>
    %86 = arith.truncf %85 : vector<8x32xf32> to vector<8x32xbf16>
    %c0_30 = arith.constant 0 : index
    %c0_31 = arith.constant 0 : index
    %87 = vector.load %arg9[%c0_30, %c0_31] : memref<32x64xbf16, #tpu.memory_space<vmem>>, vector<32x64xbf16>
    %cst_32 = arith.constant dense<0.000000e+00> : vector<8x64xf32>
    %88 = tpu.matmul %86, %87, %cst_32 {dimension_numbers = #tpu.dot_dimension_numbers<[1], [0], [0], [1], [0, 0, 1, 1], [], []>} : vector<8x32xbf16>, vector<32x64xbf16>, vector<8x64xf32> -> vector<8x64xf32>
    %c0_33 = arith.constant 0 : index
    %c0_34 = arith.constant 0 : index
    %89 = vector.load %arg10[%c0_33, %c0_34] : memref<1x64xf32, #tpu.memory_space<vmem>>, vector<1x64xf32>
    %90 = vector.broadcast %89 : vector<1x64xf32> to vector<8x64xf32>
    %91 = arith.addf %88, %90 : vector<8x64xf32>
    %cst_35 = arith.constant 0.707106769 : f32
    %92 = vector.broadcast %cst_35 : f32 to vector<8x64xf32>
    %93 = arith.mulf %91, %92 : vector<8x64xf32>
    %94 = math.absf %93 : vector<8x64xf32>
    %cst_36 = arith.constant 0.327591091 : f32
    %95 = vector.broadcast %cst_36 : f32 to vector<8x64xf32>
    %96 = arith.mulf %95, %94 : vector<8x64xf32>
    %cst_37 = arith.constant 1.000000e+00 : f32
    %97 = vector.broadcast %cst_37 : f32 to vector<8x64xf32>
    %98 = arith.addf %97, %96 : vector<8x64xf32>
    %cst_38 = arith.constant 1.000000e+00 : f32
    %99 = vector.broadcast %cst_38 : f32 to vector<8x64xf32>
    %100 = arith.divf %99, %98 : vector<8x64xf32>
    %cst_39 = arith.constant 1.06140542 : f32
    %101 = vector.broadcast %cst_39 : f32 to vector<8x64xf32>
    %102 = arith.mulf %101, %100 : vector<8x64xf32>
    %cst_40 = arith.constant 1.45315206 : f32
    %103 = vector.broadcast %cst_40 : f32 to vector<8x64xf32>
    %104 = arith.subf %102, %103 : vector<8x64xf32>
    %105 = arith.mulf %104, %100 : vector<8x64xf32>
    %cst_41 = arith.constant 1.42141378 : f32
    %106 = vector.broadcast %cst_41 : f32 to vector<8x64xf32>
    %107 = arith.addf %105, %106 : vector<8x64xf32>
    %108 = arith.mulf %107, %100 : vector<8x64xf32>
    %cst_42 = arith.constant 0.284496725 : f32
    %109 = vector.broadcast %cst_42 : f32 to vector<8x64xf32>
    %110 = arith.subf %108, %109 : vector<8x64xf32>
    %111 = arith.mulf %110, %100 : vector<8x64xf32>
    %cst_43 = arith.constant 0.254829586 : f32
    %112 = vector.broadcast %cst_43 : f32 to vector<8x64xf32>
    %113 = arith.addf %111, %112 : vector<8x64xf32>
    %114 = arith.mulf %113, %100 : vector<8x64xf32>
    %cst_44 = arith.constant 0.000000e+00 : f32
    %115 = vector.broadcast %cst_44 : f32 to vector<8x64xf32>
    %116 = arith.subf %115, %94 : vector<8x64xf32>
    %117 = arith.mulf %116, %94 : vector<8x64xf32>
    %118 = math.exp %117 : vector<8x64xf32>
    %119 = arith.mulf %114, %118 : vector<8x64xf32>
    %cst_45 = arith.constant 1.000000e+00 : f32
    %120 = vector.broadcast %cst_45 : f32 to vector<8x64xf32>
    %121 = arith.subf %120, %119 : vector<8x64xf32>
    %cst_46 = arith.constant 0.000000e+00 : f32
    %122 = vector.broadcast %cst_46 : f32 to vector<8x64xf32>
    %123 = arith.cmpf oge, %93, %122 : vector<8x64xf32>
    %cst_47 = arith.constant 0.000000e+00 : f32
    %124 = vector.broadcast %cst_47 : f32 to vector<8x64xf32>
    %125 = arith.subf %124, %121 : vector<8x64xf32>
    %126 = arith.select %123, %121, %125 : vector<8x64xi1>, vector<8x64xf32>
    %cst_48 = arith.constant 5.000000e-01 : f32
    %127 = vector.broadcast %cst_48 : f32 to vector<8x64xf32>
    %128 = arith.mulf %127, %91 : vector<8x64xf32>
    %cst_49 = arith.constant 1.000000e+00 : f32
    %129 = vector.broadcast %cst_49 : f32 to vector<8x64xf32>
    %130 = arith.addf %129, %126 : vector<8x64xf32>
    %131 = arith.mulf %128, %130 : vector<8x64xf32>
    %132 = arith.truncf %131 : vector<8x64xf32> to vector<8x64xbf16>
    %c0_50 = arith.constant 0 : index
    %c0_51 = arith.constant 0 : index
    %133 = vector.load %arg11[%c0_50, %c0_51] : memref<64x32xbf16, #tpu.memory_space<vmem>>, vector<64x32xbf16>
    %cst_52 = arith.constant dense<0.000000e+00> : vector<8x32xf32>
    %134 = tpu.matmul %132, %133, %cst_52 {dimension_numbers = #tpu.dot_dimension_numbers<[1], [0], [0], [1], [0, 0, 1, 1], [], []>} : vector<8x64xbf16>, vector<64x32xbf16>, vector<8x32xf32> -> vector<8x32xf32>
    %c0_53 = arith.constant 0 : index
    %c0_54 = arith.constant 0 : index
    %135 = vector.load %arg12[%c0_53, %c0_54] : memref<1x32xf32, #tpu.memory_space<vmem>>, vector<1x32xf32>
    %136 = vector.broadcast %135 : vector<1x32xf32> to vector<8x32xf32>
    %137 = arith.addf %134, %136 : vector<8x32xf32>
    %138 = arith.addf %137, %85 : vector<8x32xf32>
    %c0_55 = arith.constant 0 : index
    %c0_56 = arith.constant 0 : index
    %139 = vector.load %arg13[%c0_55, %c0_56] : memref<1x32xf32, #tpu.memory_space<vmem>>, vector<1x32xf32>
    %c0_57 = arith.constant 0 : index
    %c0_58 = arith.constant 0 : index
    %140 = vector.load %arg14[%c0_57, %c0_58] : memref<1x32xf32, #tpu.memory_space<vmem>>, vector<1x32xf32>
    %cst_59 = arith.constant dense<0.000000e+00> : vector<8xf32>
    %141 = vector.multi_reduction <add>, %138, %cst_59 [1] : vector<8x32xf32> to vector<8xf32>
    %142 = vector.shape_cast %141 : vector<8xf32> to vector<8x1xf32>
    %cst_60 = arith.constant 3.200000e+01 : f32
    %143 = vector.broadcast %cst_60 : f32 to vector<8x1xf32>
    %144 = arith.divf %142, %143 : vector<8x1xf32>
    %145 = vector.broadcast %144 : vector<8x1xf32> to vector<8x32xf32>
    %146 = arith.subf %138, %145 : vector<8x32xf32>
    %147 = arith.mulf %146, %146 : vector<8x32xf32>
    %cst_61 = arith.constant dense<0.000000e+00> : vector<8xf32>
    %148 = vector.multi_reduction <add>, %147, %cst_61 [1] : vector<8x32xf32> to vector<8xf32>
    %149 = vector.shape_cast %148 : vector<8xf32> to vector<8x1xf32>
    %cst_62 = arith.constant 3.200000e+01 : f32
    %150 = vector.broadcast %cst_62 : f32 to vector<8x1xf32>
    %151 = arith.divf %149, %150 : vector<8x1xf32>
    %152 = vector.broadcast %144 : vector<8x1xf32> to vector<8x32xf32>
    %153 = arith.subf %138, %152 : vector<8x32xf32>
    %cst_63 = arith.constant 9.99999996E-13 : f32
    %154 = vector.broadcast %cst_63 : f32 to vector<8x1xf32>
    %155 = arith.addf %151, %154 : vector<8x1xf32>
    %156 = math.rsqrt %155 : vector<8x1xf32>
    %157 = vector.broadcast %156 : vector<8x1xf32> to vector<8x32xf32>
    %158 = arith.mulf %153, %157 : vector<8x32xf32>
    %159 = vector.broadcast %139 : vector<1x32xf32> to vector<8x32xf32>
    %160 = arith.mulf %158, %159 : vector<8x32xf32>
    %161 = vector.broadcast %140 : vector<1x32xf32> to vector<8x32xf32>
    %162 = arith.addf %160, %161 : vector<8x32xf32>
    %c0_64 = arith.constant 0 : index
    %c0_65 = arith.constant 0 : index
    %163 = vector.load %arg15[%c0_64, %c0_65] : memref<8x32xf32, #tpu.memory_space<vmem>>, vector<8x32xf32>
    tpu.vector_store %arg15[%c0_64, %c0_65], %162 {strides = array<i32>} : memref<8x32xf32, #tpu.memory_space<vmem>>, vector<8x32xf32>,
    return
  }
  func.func @transform_0(%arg0: i32) -> (i32, i32) {
    %c0_i32 = arith.constant 0 : i32
    %c0_i32_0 = arith.constant 0 : i32
    return %arg0, %c0_i32 : i32, i32
  }
  func.func @transform_1(%arg0: i32) -> (i32, i32, i32) {
    %c0_i32 = arith.constant 0 : i32
    %c0_i32_0 = arith.constant 0 : i32
    %c0_i32_1 = arith.constant 0 : i32
    return %arg0, %c0_i32, %c0_i32_0 : i32, i32, i32
  }
  func.func @transform_2(%arg0: i32) -> (i32, i32) {
    %c0_i32 = arith.constant 0 : i32
    %c0_i32_0 = arith.constant 0 : i32
    %c0_i32_1 = arith.constant 0 : i32
    return %c0_i32, %c0_i32_0 : i32, i32
  }
  func.func @transform_3(%arg0: i32) -> (i32, i32) {
    %c0_i32 = arith.constant 0 : i32
    %c0_i32_0 = arith.constant 0 : i32
    %c0_i32_1 = arith.constant 0 : i32
    return %c0_i32, %c0_i32_0 : i32, i32
  }
  func.func @transform_4(%arg0: i32) -> (i32, i32) {
    %c0_i32 = arith.constant 0 : i32
    %c0_i32_0 = arith.constant 0 : i32
    %c0_i32_1 = arith.constant 0 : i32
    return %c0_i32, %c0_i32_0 : i32, i32
  }
  func.func @transform_5(%arg0: i32) -> (i32, i32) {
    %c0_i32 = arith.constant 0 : i32
    %c0_i32_0 = arith.constant 0 : i32
    %c0_i32_1 = arith.constant 0 : i32
    return %c0_i32, %c0_i32_0 : i32, i32
  }
  func.func @transform_6(%arg0: i32) -> (i32, i32) {
    %c0_i32 = arith.constant 0 : i32
    %c0_i32_0 = arith.constant 0 : i32
    %c0_i32_1 = arith.constant 0 : i32
    return %c0_i32, %c0_i32_0 : i32, i32
  }
  func.func @transform_7(%arg0: i32) -> (i32, i32) {
    %c0_i32 = arith.constant 0 : i32
    %c0_i32_0 = arith.constant 0 : i32
    %c0_i32_1 = arith.constant 0 : i32
    return %c0_i32, %c0_i32_0 : i32, i32
  }
  func.func @transform_8(%arg0: i32) -> (i32, i32) {
    %c0_i32 = arith.constant 0 : i32
    %c0_i32_0 = arith.constant 0 : i32
    %c0_i32_1 = arith.constant 0 : i32
    return %c0_i32, %c0_i32_0 : i32, i32
  }
  func.func @transform_9(%arg0: i32) -> (i32, i32) {
    %c0_i32 = arith.constant 0 : i32
    %c0_i32_0 = arith.constant 0 : i32
    %c0_i32_1 = arith.constant 0 : i32
    return %c0_i32, %c0_i32_0 : i32, i32
  }
  func.func @transform_10(%arg0: i32) -> (i32, i32) {
    %c0_i32 = arith.constant 0 : i32
    %c0_i32_0 = arith.constant 0 : i32
    %c0_i32_1 = arith.constant 0 : i32
    return %c0_i32, %c0_i32_0 : i32, i32
  }
  func.func @transform_11(%arg0: i32) -> (i32, i32) {
    %c0_i32 = arith.constant 0 : i32
    %c0_i32_0 = arith.constant 0 : i32
    %c0_i32_1 = arith.constant 0 : i32
    return %c0_i32, %c0_i32_0 : i32, i32
  }
  func.func @transform_12(%arg0: i32) -> (i32, i32) {
    %c0_i32 = arith.constant 0 : i32
    %c0_i32_0 = arith.constant 0 : i32
    %c0_i32_1 = arith.constant 0 : i32
    return %c0_i32, %c0_i32_0 : i32, i32
  }
  func.func @transform_13(%arg0: i32) -> (i32, i32) {
    %c0_i32 = arith.constant 0 : i32
    %c0_i32_0 = arith.constant 0 : i32
    %c0_i32_1 = arith.constant 0 : i32
    return %c0_i32, %c0_i32_0 : i32, i32
  }
  func.func @transform_14(%arg0: i32) -> (i32, i32) {
    %c0_i32 = arith.constant 0 : i32
    %c0_i32_0 = arith.constant 0 : i32
    return %arg0, %c0_i32 : i32, i32
  }
}

module attributes {stable_mosaic.version = 11 : i64} {
  func.func @_encoder_layer_kernel(%arg0: i32, %arg1: memref<8x32xf32, #tpu.memory_space<vmem>>, %arg2: memref<1x1x8xf32, #tpu.memory_space<vmem>>, %arg3: memref<1x32xf32, #tpu.memory_space<vmem>>, %arg4: memref<1x32xf32, #tpu.memory_space<vmem>>, %arg5: memref<32x96xbf16, #tpu.memory_space<vmem>>, %arg6: memref<1x96xf32, #tpu.memory_space<vmem>>, %arg7: memref<32x32xbf16, #tpu.memory_space<vmem>>, %arg8: memref<1x32xf32, #tpu.memory_space<vmem>>, %arg9: memref<1x32xf32, #tpu.memory_space<vmem>>, %arg10: memref<1x32xf32, #tpu.memory_space<vmem>>, %arg11: memref<32x64xbf16, #tpu.memory_space<vmem>>, %arg12: memref<1x64xf32, #tpu.memory_space<vmem>>, %arg13: memref<64x32xbf16, #tpu.memory_space<vmem>>, %arg14: memref<1x32xf32, #tpu.memory_space<vmem>>, %arg15: memref<1x32xf32, #tpu.memory_space<vmem>>, %arg16: memref<1x32xf32, #tpu.memory_space<vmem>>, %arg17: memref<8x32xf32, #tpu.memory_space<vmem>>) attributes {dimension_semantics = [#tpu.dimension_semantics<parallel>], iteration_bounds = array<i64: 2>, scalar_prefetch = 0 : i64, scratch_operands = 0 : i64, tpu.core_type = #tpu.core_type<tc>, window_params = [{transform_indices = @transform_0, window_bounds = array<i64: 8, 32>}, {transform_indices = @transform_1, window_bounds = array<i64: 1, 1, 8>}, {pipeline_mode = #tpu.pipeline_mode<synchronous>, transform_indices = @transform_2, window_bounds = array<i64: 1, 32>}, {pipeline_mode = #tpu.pipeline_mode<synchronous>, transform_indices = @transform_3, window_bounds = array<i64: 1, 32>}, {pipeline_mode = #tpu.pipeline_mode<synchronous>, transform_indices = @transform_4, window_bounds = array<i64: 32, 96>}, {pipeline_mode = #tpu.pipeline_mode<synchronous>, transform_indices = @transform_5, window_bounds = array<i64: 1, 96>}, {pipeline_mode = #tpu.pipeline_mode<synchronous>, transform_indices = @transform_6, window_bounds = array<i64: 32, 32>}, {pipeline_mode = #tpu.pipeline_mode<synchronous>, transform_indices = @transform_7, window_bounds = array<i64: 1, 32>}, {pipeline_mode = #tpu.pipeline_mode<synchronous>, transform_indices = @transform_8, window_bounds = array<i64: 1, 32>}, {pipeline_mode = #tpu.pipeline_mode<synchronous>, transform_indices = @transform_9, window_bounds = array<i64: 1, 32>}, {pipeline_mode = #tpu.pipeline_mode<synchronous>, transform_indices = @transform_10, window_bounds = array<i64: 32, 64>}, {pipeline_mode = #tpu.pipeline_mode<synchronous>, transform_indices = @transform_11, window_bounds = array<i64: 1, 64>}, {pipeline_mode = #tpu.pipeline_mode<synchronous>, transform_indices = @transform_12, window_bounds = array<i64: 64, 32>}, {pipeline_mode = #tpu.pipeline_mode<synchronous>, transform_indices = @transform_13, window_bounds = array<i64: 1, 32>}, {pipeline_mode = #tpu.pipeline_mode<synchronous>, transform_indices = @transform_14, window_bounds = array<i64: 1, 32>}, {pipeline_mode = #tpu.pipeline_mode<synchronous>, transform_indices = @transform_15, window_bounds = array<i64: 1, 32>}, {transform_indices = @transform_16, window_bounds = array<i64: 8, 32>}]} {
    %c0 = arith.constant 0 : index
    %c0_0 = arith.constant 0 : index
    %0 = vector.load %arg1[%c0, %c0_0] : memref<8x32xf32, #tpu.memory_space<vmem>>, vector<8x32xf32>
    %c0_1 = arith.constant 0 : index
    %c0_2 = arith.constant 0 : index
    %1 = vector.load %arg3[%c0_1, %c0_2] : memref<1x32xf32, #tpu.memory_space<vmem>>, vector<1x32xf32>
    %c0_3 = arith.constant 0 : index
    %c0_4 = arith.constant 0 : index
    %2 = vector.load %arg4[%c0_3, %c0_4] : memref<1x32xf32, #tpu.memory_space<vmem>>, vector<1x32xf32>
    %cst = arith.constant dense<0.000000e+00> : vector<8xf32>
    %3 = vector.multi_reduction <add>, %0, %cst [1] : vector<8x32xf32> to vector<8xf32>
    %4 = vector.shape_cast %3 : vector<8xf32> to vector<8x1xf32>
    %cst_5 = arith.constant 3.200000e+01 : f32
    %5 = vector.broadcast %cst_5 : f32 to vector<8x1xf32>
    %6 = arith.divf %4, %5 : vector<8x1xf32>
    %7 = vector.broadcast %6 : vector<8x1xf32> to vector<8x32xf32>
    %8 = arith.subf %0, %7 : vector<8x32xf32>
    %9 = arith.mulf %8, %8 : vector<8x32xf32>
    %cst_6 = arith.constant dense<0.000000e+00> : vector<8xf32>
    %10 = vector.multi_reduction <add>, %9, %cst_6 [1] : vector<8x32xf32> to vector<8xf32>
    %11 = vector.shape_cast %10 : vector<8xf32> to vector<8x1xf32>
    %cst_7 = arith.constant 3.200000e+01 : f32
    %12 = vector.broadcast %cst_7 : f32 to vector<8x1xf32>
    %13 = arith.divf %11, %12 : vector<8x1xf32>
    %14 = vector.broadcast %6 : vector<8x1xf32> to vector<8x32xf32>
    %15 = arith.subf %0, %14 : vector<8x32xf32>
    %cst_8 = arith.constant 9.99999996E-13 : f32
    %16 = vector.broadcast %cst_8 : f32 to vector<8x1xf32>
    %17 = arith.addf %13, %16 : vector<8x1xf32>
    %18 = math.rsqrt %17 : vector<8x1xf32>
    %19 = vector.broadcast %18 : vector<8x1xf32> to vector<8x32xf32>
    %20 = arith.mulf %15, %19 : vector<8x32xf32>
    %21 = vector.broadcast %1 : vector<1x32xf32> to vector<8x32xf32>
    %22 = arith.mulf %20, %21 : vector<8x32xf32>
    %23 = vector.broadcast %2 : vector<1x32xf32> to vector<8x32xf32>
    %24 = arith.addf %22, %23 : vector<8x32xf32>
    %25 = arith.truncf %24 : vector<8x32xf32> to vector<8x32xbf16>
    %c0_9 = arith.constant 0 : index
    %c0_10 = arith.constant 0 : index
    %c0_11 = arith.constant 0 : index
    %26 = vector.load %arg2[%c0_9, %c0_10, %c0_11] : memref<1x1x8xf32, #tpu.memory_space<vmem>>, vector<1x1x8xf32>
    %27 = vector.shape_cast %26 : vector<1x1x8xf32> to vector<1x8xf32>
    %c0_12 = arith.constant 0 : index
    %c0_13 = arith.constant 0 : index
    %28 = vector.load %arg5[%c0_12, %c0_13] : memref<32x96xbf16, #tpu.memory_space<vmem>>, vector<32x96xbf16>
    %cst_14 = arith.constant dense<0.000000e+00> : vector<8x96xf32>
    %29 = tpu.matmul %25, %28, %cst_14 {dimension_numbers = #tpu.dot_dimension_numbers<[1], [0], [0], [1], [0, 0, 1, 1], [], []>} : vector<8x32xbf16>, vector<32x96xbf16>, vector<8x96xf32> -> vector<8x96xf32>
    %c0_15 = arith.constant 0 : index
    %c0_16 = arith.constant 0 : index
    %30 = vector.load %arg6[%c0_15, %c0_16] : memref<1x96xf32, #tpu.memory_space<vmem>>, vector<1x96xf32>
    %31 = vector.broadcast %30 : vector<1x96xf32> to vector<8x96xf32>
    %32 = arith.addf %29, %31 : vector<8x96xf32>
    %33 = vector.extract_strided_slice %32 {offsets = [0, 0], sizes = [8, 32], strides = [1, 1]} : vector<8x96xf32> to vector<8x32xf32>
    %34 = vector.extract_strided_slice %32 {offsets = [0, 32], sizes = [8, 32], strides = [1, 1]} : vector<8x96xf32> to vector<8x32xf32>
    %35 = vector.extract_strided_slice %32 {offsets = [0, 64], sizes = [8, 32], strides = [1, 1]} : vector<8x96xf32> to vector<8x32xf32>
    %36 = vector.extract_strided_slice %33 {offsets = [0, 0], sizes = [8, 16], strides = [1, 1]} : vector<8x32xf32> to vector<8x16xf32>
    %37 = vector.extract_strided_slice %34 {offsets = [0, 0], sizes = [8, 16], strides = [1, 1]} : vector<8x32xf32> to vector<8x16xf32>
    %38 = vector.extract_strided_slice %35 {offsets = [0, 0], sizes = [8, 16], strides = [1, 1]} : vector<8x32xf32> to vector<8x16xf32>
    %39 = arith.truncf %36 : vector<8x16xf32> to vector<8x16xbf16>
    %40 = arith.truncf %37 : vector<8x16xf32> to vector<8x16xbf16>
    %cst_17 = arith.constant dense<0.000000e+00> : vector<8x8xf32>
    %41 = tpu.matmul %39, %40, %cst_17 {dimension_numbers = #tpu.dot_dimension_numbers<[1], [1], [0], [0], [0, 0, 1, 0], [], []>} : vector<8x16xbf16>, vector<8x16xbf16>, vector<8x8xf32> -> vector<8x8xf32>
    %42 = vector.broadcast %27 : vector<1x8xf32> to vector<8x8xf32>
    %43 = arith.addf %41, %42 : vector<8x8xf32>
    %cst_18 = arith.constant dense<0xFF800000> : vector<8xf32>
    %44 = vector.multi_reduction <maximumf>, %43, %cst_18 [1] : vector<8x8xf32> to vector<8xf32>
    %45 = vector.shape_cast %44 : vector<8xf32> to vector<8x1xf32>
    %46 = vector.broadcast %45 : vector<8x1xf32> to vector<8x8xf32>
    %47 = arith.subf %43, %46 : vector<8x8xf32>
    %48 = math.exp %47 : vector<8x8xf32>
    %cst_19 = arith.constant dense<0.000000e+00> : vector<8xf32>
    %49 = vector.multi_reduction <add>, %48, %cst_19 [1] : vector<8x8xf32> to vector<8xf32>
    %50 = vector.shape_cast %49 : vector<8xf32> to vector<8x1xf32>
    %51 = tpu.reciprocal %50 {approx = true} : vector<8x1xf32> -> vector<8x1xf32>
    %52 = vector.broadcast %51 : vector<8x1xf32> to vector<8x8xf32>
    %53 = arith.mulf %48, %52 : vector<8x8xf32>
    %54 = arith.truncf %53 : vector<8x8xf32> to vector<8x8xbf16>
    %55 = arith.truncf %38 : vector<8x16xf32> to vector<8x16xbf16>
    %cst_20 = arith.constant dense<0.000000e+00> : vector<8x16xf32>
    %56 = tpu.matmul %54, %55, %cst_20 {dimension_numbers = #tpu.dot_dimension_numbers<[1], [0], [0], [1], [0, 0, 1, 1], [], []>} : vector<8x8xbf16>, vector<8x16xbf16>, vector<8x16xf32> -> vector<8x16xf32>
    %57 = vector.extract_strided_slice %33 {offsets = [0, 16], sizes = [8, 16], strides = [1, 1]} : vector<8x32xf32> to vector<8x16xf32>
    %58 = vector.extract_strided_slice %34 {offsets = [0, 16], sizes = [8, 16], strides = [1, 1]} : vector<8x32xf32> to vector<8x16xf32>
    %59 = vector.extract_strided_slice %35 {offsets = [0, 16], sizes = [8, 16], strides = [1, 1]} : vector<8x32xf32> to vector<8x16xf32>
    %60 = arith.truncf %57 : vector<8x16xf32> to vector<8x16xbf16>
    %61 = arith.truncf %58 : vector<8x16xf32> to vector<8x16xbf16>
    %cst_21 = arith.constant dense<0.000000e+00> : vector<8x8xf32>
    %62 = tpu.matmul %60, %61, %cst_21 {dimension_numbers = #tpu.dot_dimension_numbers<[1], [1], [0], [0], [0, 0, 1, 0], [], []>} : vector<8x16xbf16>, vector<8x16xbf16>, vector<8x8xf32> -> vector<8x8xf32>
    %63 = vector.broadcast %27 : vector<1x8xf32> to vector<8x8xf32>
    %64 = arith.addf %62, %63 : vector<8x8xf32>
    %cst_22 = arith.constant dense<0xFF800000> : vector<8xf32>
    %65 = vector.multi_reduction <maximumf>, %64, %cst_22 [1] : vector<8x8xf32> to vector<8xf32>
    %66 = vector.shape_cast %65 : vector<8xf32> to vector<8x1xf32>
    %67 = vector.broadcast %66 : vector<8x1xf32> to vector<8x8xf32>
    %68 = arith.subf %64, %67 : vector<8x8xf32>
    %69 = math.exp %68 : vector<8x8xf32>
    %cst_23 = arith.constant dense<0.000000e+00> : vector<8xf32>
    %70 = vector.multi_reduction <add>, %69, %cst_23 [1] : vector<8x8xf32> to vector<8xf32>
    %71 = vector.shape_cast %70 : vector<8xf32> to vector<8x1xf32>
    %72 = tpu.reciprocal %71 {approx = true} : vector<8x1xf32> -> vector<8x1xf32>
    %73 = vector.broadcast %72 : vector<8x1xf32> to vector<8x8xf32>
    %74 = arith.mulf %69, %73 : vector<8x8xf32>
    %75 = arith.truncf %74 : vector<8x8xf32> to vector<8x8xbf16>
    %76 = arith.truncf %59 : vector<8x16xf32> to vector<8x16xbf16>
    %cst_24 = arith.constant dense<0.000000e+00> : vector<8x16xf32>
    %77 = tpu.matmul %75, %76, %cst_24 {dimension_numbers = #tpu.dot_dimension_numbers<[1], [0], [0], [1], [0, 0, 1, 1], [], []>} : vector<8x8xbf16>, vector<8x16xbf16>, vector<8x16xf32> -> vector<8x16xf32>
    %78 = tpu.concatenate %56, %77 in 1 : vector<8x16xf32>, vector<8x16xf32> -> vector<8x32xf32>
    %79 = arith.truncf %78 : vector<8x32xf32> to vector<8x32xbf16>
    %c0_25 = arith.constant 0 : index
    %c0_26 = arith.constant 0 : index
    %80 = vector.load %arg7[%c0_25, %c0_26] : memref<32x32xbf16, #tpu.memory_space<vmem>>, vector<32x32xbf16>
    %cst_27 = arith.constant dense<0.000000e+00> : vector<8x32xf32>
    %81 = tpu.matmul %79, %80, %cst_27 {dimension_numbers = #tpu.dot_dimension_numbers<[1], [0], [0], [1], [0, 0, 1, 1], [], []>} : vector<8x32xbf16>, vector<32x32xbf16>, vector<8x32xf32> -> vector<8x32xf32>
    %c0_28 = arith.constant 0 : index
    %c0_29 = arith.constant 0 : index
    %82 = vector.load %arg8[%c0_28, %c0_29] : memref<1x32xf32, #tpu.memory_space<vmem>>, vector<1x32xf32>
    %83 = vector.broadcast %82 : vector<1x32xf32> to vector<8x32xf32>
    %84 = arith.addf %81, %83 : vector<8x32xf32>
    %85 = arith.addf %84, %24 : vector<8x32xf32>
    %c0_30 = arith.constant 0 : index
    %c0_31 = arith.constant 0 : index
    %86 = vector.load %arg9[%c0_30, %c0_31] : memref<1x32xf32, #tpu.memory_space<vmem>>, vector<1x32xf32>
    %c0_32 = arith.constant 0 : index
    %c0_33 = arith.constant 0 : index
    %87 = vector.load %arg10[%c0_32, %c0_33] : memref<1x32xf32, #tpu.memory_space<vmem>>, vector<1x32xf32>
    %cst_34 = arith.constant dense<0.000000e+00> : vector<8xf32>
    %88 = vector.multi_reduction <add>, %85, %cst_34 [1] : vector<8x32xf32> to vector<8xf32>
    %89 = vector.shape_cast %88 : vector<8xf32> to vector<8x1xf32>
    %cst_35 = arith.constant 3.200000e+01 : f32
    %90 = vector.broadcast %cst_35 : f32 to vector<8x1xf32>
    %91 = arith.divf %89, %90 : vector<8x1xf32>
    %92 = vector.broadcast %91 : vector<8x1xf32> to vector<8x32xf32>
    %93 = arith.subf %85, %92 : vector<8x32xf32>
    %94 = arith.mulf %93, %93 : vector<8x32xf32>
    %cst_36 = arith.constant dense<0.000000e+00> : vector<8xf32>
    %95 = vector.multi_reduction <add>, %94, %cst_36 [1] : vector<8x32xf32> to vector<8xf32>
    %96 = vector.shape_cast %95 : vector<8xf32> to vector<8x1xf32>
    %cst_37 = arith.constant 3.200000e+01 : f32
    %97 = vector.broadcast %cst_37 : f32 to vector<8x1xf32>
    %98 = arith.divf %96, %97 : vector<8x1xf32>
    %99 = vector.broadcast %91 : vector<8x1xf32> to vector<8x32xf32>
    %100 = arith.subf %85, %99 : vector<8x32xf32>
    %cst_38 = arith.constant 9.99999996E-13 : f32
    %101 = vector.broadcast %cst_38 : f32 to vector<8x1xf32>
    %102 = arith.addf %98, %101 : vector<8x1xf32>
    %103 = math.rsqrt %102 : vector<8x1xf32>
    %104 = vector.broadcast %103 : vector<8x1xf32> to vector<8x32xf32>
    %105 = arith.mulf %100, %104 : vector<8x32xf32>
    %106 = vector.broadcast %86 : vector<1x32xf32> to vector<8x32xf32>
    %107 = arith.mulf %105, %106 : vector<8x32xf32>
    %108 = vector.broadcast %87 : vector<1x32xf32> to vector<8x32xf32>
    %109 = arith.addf %107, %108 : vector<8x32xf32>
    %110 = arith.truncf %109 : vector<8x32xf32> to vector<8x32xbf16>
    %c0_39 = arith.constant 0 : index
    %c0_40 = arith.constant 0 : index
    %111 = vector.load %arg11[%c0_39, %c0_40] : memref<32x64xbf16, #tpu.memory_space<vmem>>, vector<32x64xbf16>
    %cst_41 = arith.constant dense<0.000000e+00> : vector<8x64xf32>
    %112 = tpu.matmul %110, %111, %cst_41 {dimension_numbers = #tpu.dot_dimension_numbers<[1], [0], [0], [1], [0, 0, 1, 1], [], []>} : vector<8x32xbf16>, vector<32x64xbf16>, vector<8x64xf32> -> vector<8x64xf32>
    %c0_42 = arith.constant 0 : index
    %c0_43 = arith.constant 0 : index
    %113 = vector.load %arg12[%c0_42, %c0_43] : memref<1x64xf32, #tpu.memory_space<vmem>>, vector<1x64xf32>
    %114 = vector.broadcast %113 : vector<1x64xf32> to vector<8x64xf32>
    %115 = arith.addf %112, %114 : vector<8x64xf32>
    %cst_44 = arith.constant 0.707106769 : f32
    %116 = vector.broadcast %cst_44 : f32 to vector<8x64xf32>
    %117 = arith.mulf %115, %116 : vector<8x64xf32>
    %118 = math.absf %117 : vector<8x64xf32>
    %cst_45 = arith.constant 0.327591091 : f32
    %119 = vector.broadcast %cst_45 : f32 to vector<8x64xf32>
    %120 = arith.mulf %119, %118 : vector<8x64xf32>
    %cst_46 = arith.constant 1.000000e+00 : f32
    %121 = vector.broadcast %cst_46 : f32 to vector<8x64xf32>
    %122 = arith.addf %121, %120 : vector<8x64xf32>
    %cst_47 = arith.constant 1.000000e+00 : f32
    %123 = vector.broadcast %cst_47 : f32 to vector<8x64xf32>
    %124 = arith.divf %123, %122 : vector<8x64xf32>
    %cst_48 = arith.constant 1.06140542 : f32
    %125 = vector.broadcast %cst_48 : f32 to vector<8x64xf32>
    %126 = arith.mulf %125, %124 : vector<8x64xf32>
    %cst_49 = arith.constant 1.45315206 : f32
    %127 = vector.broadcast %cst_49 : f32 to vector<8x64xf32>
    %128 = arith.subf %126, %127 : vector<8x64xf32>
    %129 = arith.mulf %128, %124 : vector<8x64xf32>
    %cst_50 = arith.constant 1.42141378 : f32
    %130 = vector.broadcast %cst_50 : f32 to vector<8x64xf32>
    %131 = arith.addf %129, %130 : vector<8x64xf32>
    %132 = arith.mulf %131, %124 : vector<8x64xf32>
    %cst_51 = arith.constant 0.284496725 : f32
    %133 = vector.broadcast %cst_51 : f32 to vector<8x64xf32>
    %134 = arith.subf %132, %133 : vector<8x64xf32>
    %135 = arith.mulf %134, %124 : vector<8x64xf32>
    %cst_52 = arith.constant 0.254829586 : f32
    %136 = vector.broadcast %cst_52 : f32 to vector<8x64xf32>
    %137 = arith.addf %135, %136 : vector<8x64xf32>
    %138 = arith.mulf %137, %124 : vector<8x64xf32>
    %cst_53 = arith.constant 0.000000e+00 : f32
    %139 = vector.broadcast %cst_53 : f32 to vector<8x64xf32>
    %140 = arith.subf %139, %118 : vector<8x64xf32>
    %141 = arith.mulf %140, %118 : vector<8x64xf32>
    %142 = math.exp %141 : vector<8x64xf32>
    %143 = arith.mulf %138, %142 : vector<8x64xf32>
    %cst_54 = arith.constant 1.000000e+00 : f32
    %144 = vector.broadcast %cst_54 : f32 to vector<8x64xf32>
    %145 = arith.subf %144, %143 : vector<8x64xf32>
    %cst_55 = arith.constant 0.000000e+00 : f32
    %146 = vector.broadcast %cst_55 : f32 to vector<8x64xf32>
    %147 = arith.cmpf oge, %117, %146 : vector<8x64xf32>
    %cst_56 = arith.constant 0.000000e+00 : f32
    %148 = vector.broadcast %cst_56 : f32 to vector<8x64xf32>
    %149 = arith.subf %148, %145 : vector<8x64xf32>
    %150 = arith.select %147, %145, %149 : vector<8x64xi1>, vector<8x64xf32>
    %cst_57 = arith.constant 5.000000e-01 : f32
    %151 = vector.broadcast %cst_57 : f32 to vector<8x64xf32>
    %152 = arith.mulf %151, %115 : vector<8x64xf32>
    %cst_58 = arith.constant 1.000000e+00 : f32
    %153 = vector.broadcast %cst_58 : f32 to vector<8x64xf32>
    %154 = arith.addf %153, %150 : vector<8x64xf32>
    %155 = arith.mulf %152, %154 : vector<8x64xf32>
    %156 = arith.truncf %155 : vector<8x64xf32> to vector<8x64xbf16>
    %c0_59 = arith.constant 0 : index
    %c0_60 = arith.constant 0 : index
    %157 = vector.load %arg13[%c0_59, %c0_60] : memref<64x32xbf16, #tpu.memory_space<vmem>>, vector<64x32xbf16>
    %cst_61 = arith.constant dense<0.000000e+00> : vector<8x32xf32>
    %158 = tpu.matmul %156, %157, %cst_61 {dimension_numbers = #tpu.dot_dimension_numbers<[1], [0], [0], [1], [0, 0, 1, 1], [], []>} : vector<8x64xbf16>, vector<64x32xbf16>, vector<8x32xf32> -> vector<8x32xf32>
    %c0_62 = arith.constant 0 : index
    %c0_63 = arith.constant 0 : index
    %159 = vector.load %arg14[%c0_62, %c0_63] : memref<1x32xf32, #tpu.memory_space<vmem>>, vector<1x32xf32>
    %160 = vector.broadcast %159 : vector<1x32xf32> to vector<8x32xf32>
    %161 = arith.addf %158, %160 : vector<8x32xf32>
    %162 = arith.addf %161, %109 : vector<8x32xf32>
    %c0_64 = arith.constant 0 : index
    %c0_65 = arith.constant 0 : index
    %163 = vector.load %arg15[%c0_64, %c0_65] : memref<1x32xf32, #tpu.memory_space<vmem>>, vector<1x32xf32>
    %c0_66 = arith.constant 0 : index
    %c0_67 = arith.constant 0 : index
    %164 = vector.load %arg16[%c0_66, %c0_67] : memref<1x32xf32, #tpu.memory_space<vmem>>, vector<1x32xf32>
    %cst_68 = arith.constant dense<0.000000e+00> : vector<8xf32>
    %165 = vector.multi_reduction <add>, %162, %cst_68 [1] : vector<8x32xf32> to vector<8xf32>
    %166 = vector.shape_cast %165 : vector<8xf32> to vector<8x1xf32>
    %cst_69 = arith.constant 3.200000e+01 : f32
    %167 = vector.broadcast %cst_69 : f32 to vector<8x1xf32>
    %168 = arith.divf %166, %167 : vector<8x1xf32>
    %169 = vector.broadcast %168 : vector<8x1xf32> to vector<8x32xf32>
    %170 = arith.subf %162, %169 : vector<8x32xf32>
    %171 = arith.mulf %170, %170 : vector<8x32xf32>
    %cst_70 = arith.constant dense<0.000000e+00> : vector<8xf32>
    %172 = vector.multi_reduction <add>, %171, %cst_70 [1] : vector<8x32xf32> to vector<8xf32>
    %173 = vector.shape_cast %172 : vector<8xf32> to vector<8x1xf32>
    %cst_71 = arith.constant 3.200000e+01 : f32
    %174 = vector.broadcast %cst_71 : f32 to vector<8x1xf32>
    %175 = arith.divf %173, %174 : vector<8x1xf32>
    %176 = vector.broadcast %168 : vector<8x1xf32> to vector<8x32xf32>
    %177 = arith.subf %162, %176 : vector<8x32xf32>
    %cst_72 = arith.constant 9.99999996E-13 : f32
    %178 = vector.broadcast %cst_72 : f32 to vector<8x1xf32>
    %179 = arith.addf %175, %178 : vector<8x1xf32>
    %180 = math.rsqrt %179 : vector<8x1xf32>
    %181 = vector.broadcast %180 : vector<8x1xf32> to vector<8x32xf32>
    %182 = arith.mulf %177, %181 : vector<8x32xf32>
    %183 = vector.broadcast %163 : vector<1x32xf32> to vector<8x32xf32>
    %184 = arith.mulf %182, %183 : vector<8x32xf32>
    %185 = vector.broadcast %164 : vector<1x32xf32> to vector<8x32xf32>
    %186 = arith.addf %184, %185 : vector<8x32xf32>
    %c0_73 = arith.constant 0 : index
    %c0_74 = arith.constant 0 : index
    %187 = vector.load %arg17[%c0_73, %c0_74] : memref<8x32xf32, #tpu.memory_space<vmem>>, vector<8x32xf32>
    tpu.vector_store %arg17[%c0_73, %c0_74], %186 {strides = array<i32>} : memref<8x32xf32, #tpu.memory_space<vmem>>, vector<8x32xf32>,
    return
  }
  func.func @transform_0(%arg0: i32) -> (i32, i32) {
    %c0_i32 = arith.constant 0 : i32
    %c0_i32_0 = arith.constant 0 : i32
    return %arg0, %c0_i32 : i32, i32
  }
  func.func @transform_1(%arg0: i32) -> (i32, i32, i32) {
    %c0_i32 = arith.constant 0 : i32
    %c0_i32_0 = arith.constant 0 : i32
    %c0_i32_1 = arith.constant 0 : i32
    return %arg0, %c0_i32, %c0_i32_0 : i32, i32, i32
  }
  func.func @transform_2(%arg0: i32) -> (i32, i32) {
    %c0_i32 = arith.constant 0 : i32
    %c0_i32_0 = arith.constant 0 : i32
    %c0_i32_1 = arith.constant 0 : i32
    return %c0_i32, %c0_i32_0 : i32, i32
  }
  func.func @transform_3(%arg0: i32) -> (i32, i32) {
    %c0_i32 = arith.constant 0 : i32
    %c0_i32_0 = arith.constant 0 : i32
    %c0_i32_1 = arith.constant 0 : i32
    return %c0_i32, %c0_i32_0 : i32, i32
  }
  func.func @transform_4(%arg0: i32) -> (i32, i32) {
    %c0_i32 = arith.constant 0 : i32
    %c0_i32_0 = arith.constant 0 : i32
    %c0_i32_1 = arith.constant 0 : i32
    return %c0_i32, %c0_i32_0 : i32, i32
  }
  func.func @transform_5(%arg0: i32) -> (i32, i32) {
    %c0_i32 = arith.constant 0 : i32
    %c0_i32_0 = arith.constant 0 : i32
    %c0_i32_1 = arith.constant 0 : i32
    return %c0_i32, %c0_i32_0 : i32, i32
  }
  func.func @transform_6(%arg0: i32) -> (i32, i32) {
    %c0_i32 = arith.constant 0 : i32
    %c0_i32_0 = arith.constant 0 : i32
    %c0_i32_1 = arith.constant 0 : i32
    return %c0_i32, %c0_i32_0 : i32, i32
  }
  func.func @transform_7(%arg0: i32) -> (i32, i32) {
    %c0_i32 = arith.constant 0 : i32
    %c0_i32_0 = arith.constant 0 : i32
    %c0_i32_1 = arith.constant 0 : i32
    return %c0_i32, %c0_i32_0 : i32, i32
  }
  func.func @transform_8(%arg0: i32) -> (i32, i32) {
    %c0_i32 = arith.constant 0 : i32
    %c0_i32_0 = arith.constant 0 : i32
    %c0_i32_1 = arith.constant 0 : i32
    return %c0_i32, %c0_i32_0 : i32, i32
  }
  func.func @transform_9(%arg0: i32) -> (i32, i32) {
    %c0_i32 = arith.constant 0 : i32
    %c0_i32_0 = arith.constant 0 : i32
    %c0_i32_1 = arith.constant 0 : i32
    return %c0_i32, %c0_i32_0 : i32, i32
  }
  func.func @transform_10(%arg0: i32) -> (i32, i32) {
    %c0_i32 = arith.constant 0 : i32
    %c0_i32_0 = arith.constant 0 : i32
    %c0_i32_1 = arith.constant 0 : i32
    return %c0_i32, %c0_i32_0 : i32, i32
  }
  func.func @transform_11(%arg0: i32) -> (i32, i32) {
    %c0_i32 = arith.constant 0 : i32
    %c0_i32_0 = arith.constant 0 : i32
    %c0_i32_1 = arith.constant 0 : i32
    return %c0_i32, %c0_i32_0 : i32, i32
  }
  func.func @transform_12(%arg0: i32) -> (i32, i32) {
    %c0_i32 = arith.constant 0 : i32
    %c0_i32_0 = arith.constant 0 : i32
    %c0_i32_1 = arith.constant 0 : i32
    return %c0_i32, %c0_i32_0 : i32, i32
  }
  func.func @transform_13(%arg0: i32) -> (i32, i32) {
    %c0_i32 = arith.constant 0 : i32
    %c0_i32_0 = arith.constant 0 : i32
    %c0_i32_1 = arith.constant 0 : i32
    return %c0_i32, %c0_i32_0 : i32, i32
  }
  func.func @transform_14(%arg0: i32) -> (i32, i32) {
    %c0_i32 = arith.constant 0 : i32
    %c0_i32_0 = arith.constant 0 : i32
    %c0_i32_1 = arith.constant 0 : i32
    return %c0_i32, %c0_i32_0 : i32, i32
  }
  func.func @transform_15(%arg0: i32) -> (i32, i32) {
    %c0_i32 = arith.constant 0 : i32
    %c0_i32_0 = arith.constant 0 : i32
    %c0_i32_1 = arith.constant 0 : i32
    return %c0_i32, %c0_i32_0 : i32, i32
  }
  func.func @transform_16(%arg0: i32) -> (i32, i32) {
    %c0_i32 = arith.constant 0 : i32
    %c0_i32_0 = arith.constant 0 : i32
    return %arg0, %c0_i32 : i32, i32
  }
}

</mosaic_0001>

<bundles_post_ra>
// kernel: bert_finetune_forward.5
= control target key start
LH: loop header
LB: loop body
LE: loop exit
PB: predicated region body
PF: predicated region fallthrough
CT: control target
= control target key end

     0   :  { %v273_v1 = vmov 0.0   ;;  %vm82_vm0 = vcmask 261120   ;;  %vm274_vm1 = vmmov 0   ;;  %s352_s0 = inlined_call_operand.vmem [shape: f32[16,32], index: 0, kind: input, shape index: {}]   ;;  %s353_s1 = inlined_call_operand.vmem [shape: bf16[128,32], index: 1, kind: input, shape index: {}]   ;;  %s354_s2 = inlined_call_operand.vmem [shape: f32[1,128], index: 2, kind: input, shape index: {}]   ;;  %s355_s3 = inlined_call_operand.hbm [shape: f32[16,128], index: 3, kind: output, shape index: {}]  }
   0x1   :  { %v233_v0 = vld [vmem:[%s353_s1] sm:$0xff]   ;;  %208 = vmatprep.subr.bf16.mxu0 %v273_v1  ;;  %v234_v3 = vld [vmem:[%s353_s1 + $0x8] sm:$0xff]   ;;  %224 = vmatprep.mubr.msk.bf16.mxu0 %vm274_vm1, %v273_v1 }
   0x2   :  { %v87_v2 = vsel %vm82_vm0, %v233_v0, 0  ;;  %v90_v4 = vsel %vm82_vm0, %v234_v3, 0 }
   0x3   :  { %209 = vmatpush3.bf16.xpose.msra.mxu0 %v87_v2 }
   0x4   :  { %210 = vmatprep.subr.bf16.mxu0 %v273_v1 }
   0x5   :  { %8 = vsyncpa [#allocation3], 0  ;;  %v235_v5 = vld [vmem:[%s353_s1 + $0x10] sm:$0xff]   ;;  %v236_v7 = vld [vmem:[%s353_s1 + $0x18] sm:$0xff]  }
   0x6   :  { %v93_v6 = vsel %vm82_vm0, %v235_v5, 0  ;;  %v96_v8 = vsel %vm82_vm0, %v236_v7, 0  ;;  %v237_v9 = vld [vmem:[%s353_s1 + $0x20] sm:$0xff]   ;;  %v238_v11 = vld [vmem:[%s353_s1 + $0x28] sm:$0xff]   ;;  %v239_v13 = vld [vmem:[%s353_s1 + $0x30] sm:$0xff]  }
   0x7   :  { %v99_v10 = vsel %vm82_vm0, %v237_v9, 0  ;;  %v102_v12 = vsel %vm82_vm0, %v238_v11, 0  ;;  %v105_v14 = vsel %vm82_vm0, %v239_v13, 0  ;;  %v240_v15 = vld [vmem:[%s353_s1 + $0x38] sm:$0xff]   ;;  %v16_v17 = vld [vmem:[%s352_s0] sm:$0xff]  ;;  %v17_v18 = vld [vmem:[%s352_s0 + $0x8] sm:$0xff] }
   0x8   :  { %v108_v16 = vsel %vm82_vm0, %v240_v15, 0  ;;  %v18_v19 = vpack.c.bf16 %v17_v18, %v16_v17  ;;  %v189_v20 = vld [vmem:[%s354_s2] ss:$0 sm:$0xff]  ;;  %s275_s0 = smov [#allocation2]  }
   0x9   :  { %s178_s1 = sshll.u32 %s275_s0, 4  ;;  %s179_s1 = int_to_ptr.vmem [resolvable:$true] %s178_s1 }
   0xa   :  { %s249_s2 = scalar_lea.vmem %s179_s1, 256  ;;  %p254_p1 = scmp.lt.s32.totalorder %s179_s1, %s179_s1 }
   0xb   :  { %211 = vmatpush3.bf16.xpose.msra.mxu0 %v90_v4  ;;  %p250_p0 = scmp.ne.s32.totalorder %s179_s1, %s249_s2  ;;  %p255_p2 = scmp.lt.s32.totalorder %s249_s2, %s249_s2 }
   0xc   :  { %212 = vmatprep.subr.bf16.mxu0 %v273_v1 }
   0xd   :  { %p256_p3 = por %p255_p2, %p254_p1 }
   0xf   :  { %p257_p4 = pnand %p256_p3, %p250_p0 }
  0x13   :  { %213 = vmatpush3.bf16.xpose.msra.mxu0 %v93_v6 }
  0x14   :  { %214 = vmatprep.subr.bf16.mxu0 %v273_v1 }
  0x1b   :  { %215 = vmatpush3.bf16.xpose.msra.mxu0 %v96_v8 }
  0x1c   :  { %216 = vmatprep.subr.bf16.mxu0 %v273_v1 }
  0x23   :  { %217 = vmatpush3.bf16.xpose.msra.mxu0 %v99_v10 }
  0x24   :  { %218 = vmatprep.subr.bf16.mxu0 %v273_v1 }
  0x2b   :  { %219 = vmatpush3.bf16.xpose.msra.mxu0 %v102_v12 }
  0x2c   :  { %220 = vmatprep.subr.bf16.mxu0 %v273_v1 }
  0x33   :  { %221 = vmatpush3.bf16.xpose.msra.mxu0 %v105_v14 }
  0x34   :  { %222 = vmatprep.subr.bf16.mxu0 %v273_v1 }
  0x3b   :  { %223 = vmatpush3.bf16.xpose.msra.mxu0 %v108_v16 }
  0x42   :  { %225 = vmatmul.mubr.msk.bf16.vlgmr.msra.gmra.mrb[0].mxu0 %vm82_vm0, %v18_v19 }
 0x115   :  { %v144_v21 = vpop.f32.mrb[0].mxu0 }
 0x116   :  { %v145_v22 = vadd.f32 %v189_v20, %v144_v21  ;;  %v226_v23 = vpop.f32.mrb[1].mxu0 }
 0x117   :  { %v147_v24 = vpop.f32.mrb[2].mxu0 }
 0x118   :  { %151 = vmax.xlane.f32.xlu0 %v145_v22  ;;  %v227_v25 = vpop.f32.mrb[3].mxu0  ;;  %v148_v26 = vadd.f32 %v189_v20, %v147_v24 }
 0x11c   :  { %153 = vmax.xlane.f32.xlu0 %v148_v26 }
 0x1a5   :  { %v152_v27 = vpop.xlane.xlu0 %151 }
 0x1a6   :  { %v155_v28 = vsub.f32 %v145_v22, %v152_v27 }
 0x1a8   :  { %v157_v29 = vmul.f32 1.442695, %v155_v28 }
 0x1a9   :  { %v154_v30 = vpop.xlane.xlu0 %153 }
 0x1aa   :  { %v156_v31 = vsub.f32 %v148_v26, %v154_v30  ;;  %241 = vpow2.f32 %v157_v29 }
 0x1ac   :  { %v159_v32 = vmul.f32 1.442695, %v156_v31 }
 0x1ae   :  { %243 = vpow2.f32 %v159_v32 }
 0x1b4   :  { %v242_v33 = vpop.eup %241 }
 0x1b5   :  { %161 = vadd.xlane.f32.xlu1 %v242_v33 }
 0x1b8   :  { %v244_v34 = vpop.eup %243 }
 0x1b9   :  { %163 = vadd.xlane.f32.xlu1 %v244_v34 }
 0x242   :  { %v162_v35 = vpop.xlane.xlu1 %161 }
 0x243   :  { %245 = vlog2.f32 %v162_v35 }
 0x246   :  { %v164_v36 = vpop.xlane.xlu1 %163 }
 0x247   :  { %247 = vlog2.f32 %v164_v36 }
 0x24d   :  { %v246_v37 = vpop.eup %245 }
 0x24e   :  { %v166_v38 = vmul.f32 0.6931472, %v246_v37 }
 0x250   :  { %v169_v39 = vsub.f32 %v155_v28, %v166_v38 }
 0x251   :  { %v248_v40 = vpop.eup %247 }
 0x252   :  { %171 = vst [vmem:[#allocation2] sm:$0xff] %v169_v39  ;;  %v168_v41 = vmul.f32 0.6931472, %v248_v40 }
 0x254   :  { %v170_v42 = vsub.f32 %v156_v31, %v168_v41 }
 0x256   :  { %172 = vst [vmem:[#allocation2 + $0x8] sm:$0xff] %v170_v42 }
 0x257   :  { %260 = shalt.err (!%p257_p4)
}
 0x258   :  { %s261_s9 = scalar_lea.hbm %s355_s3, 256 }
 0x259   :  { %p262_p5 = scmp.ne.s32.totalorder %s355_s3, %s261_s9  ;;  %p265_p6 = scmp.lt.u32.totalorder %s261_s9, %s355_s3 }
 0x25b   :  { %p267_p7 = pnand %p265_p6, %p262_p5 }
 0x25d   :  { %270 = shalt.err (!%p267_p7)
}
 0x25e   :  { %s276_s14 = smov 128   ;;  %s277_s15 = smov 8  }
 0x25f   :  { %184 = dma.vmem_to_hbm [thread:$0]  %s179_s1, 256, %s355_s3, [#allocation3], %s276_s14, %s276_s14, %s277_s15  }
 0x260   :  { %271 = dma.done.wait [#allocation3], 256  }
 0x261   :  { %272 = vsyncadd [#allocation3], 4294967040 }
 0x262   :  { %188 = vsyncpa [#allocation3], 1 }

// kernel: bert_finetune_forward.4
= control target key start
LH: loop header
LB: loop body
LE: loop exit
PB: predicated region body
PF: predicated region fallthrough
CT: control target
= control target key end

     0   :  { %s1404_s29 = smov 0   ;;  %s1540_s0 = inlined_call_operand.vmem [shape: f32[16,32], index: 0, kind: input, shape index: {}]   ;;  %s1541_s1 = inlined_call_operand.vmem [shape: f32[2,1,8], index: 1, kind: input, shape index: {}]   ;;  %s1542_s2 = inlined_call_operand.vmem [shape: bf16[32,96], index: 2, kind: input, shape index: {}]   ;;  %s1543_s3 = inlined_call_operand.vmem [shape: f32[1,96], index: 3, kind: input, shape index: {}]   ;;  %s1544_s4 = inlined_call_operand.vmem [shape: bf16[32,32], index: 4, kind: input, shape index: {}]   ;;  %s1545_s5 = inlined_call_operand.vmem [shape: f32[1,32], index: 5, kind: input, shape index: {}]   ;;  %s1546_s6 = inlined_call_operand.vmem [shape: f32[1,32], index: 6, kind: input, shape index: {}]   ;;  %s1547_s7 = inlined_call_operand.vmem [shape: f32[1,32], index: 7, kind: input, shape index: {}]   ;;  %s1548_s8 = inlined_call_operand.vmem [shape: bf16[32,64], index: 8, kind: input, shape index: {}]   ;;  %s1549_s9 = inlined_call_operand.vmem [shape: f32[1,64], index: 9, kind: input, shape index: {}]   ;;  %s1550_s10 = inlined_call_operand.vmem [shape: bf16[64,32], index: 10, kind: input, shape index: {}]   ;;  %s1551_s11 = inlined_call_operand.vmem [shape: f32[1,32], index: 11, kind: input, shape index: {}]   ;;  %s1552_s12 = inlined_call_operand.vmem [shape: f32[1,32], index: 12, kind: input, shape index: {}]   ;;  %s1553_s13 = inlined_call_operand.vmem [shape: f32[1,32], index: 13, kind: input, shape index: {}]   ;;  %s1554_s14 = inlined_call_operand.vmem [shape: f32[16,32], index: 14, kind: output, shape index: {}]  }
   0x1 LB: > { %s1151_s30 = sadd.s32 4294967295, %s1319_s29   ;;  %p1155_p0 = scmp.ge.s32.totalorder %s1319_s29, 1  ;;  %s1319_s29 = sphi %s1404_s29, %s24_s29  }
   0x2   : > { %p419_p1 = scmp.lt.s32.totalorder %s1319_s29, 3 }
   0x4   : > { %p420_p2 = pnand %p1155_p0, %p419_p1 }
   0x5   : > { %v1287_v0 = vld [vmem:[%s1542_s2] sm:$0xff] (!%p420_p2)   ;;  %v1321_v1 = vmov (!%p420_p2), 0.0   ;;  %v1288_v2 = vld [vmem:[%s1542_s2 + $0x8] sm:$0xff] (!%p420_p2)   ;;  %vm1322_vm0 = vmmov (!%p420_p2), 0   ;;  %p466_p3 = scmp.lt.s32.totalorder (!%p420_p2), %s1151_s30, 1  ;;  %vm504_vm1 = vcmask (!%p420_p2), 261120  }
   0x6   : > { %423 = sbr.rel (%p420_p2) target bundleno = 2551 (0x9f7), region = 76  ;;  %1211 = vmatprep.subr.bf16.mxu0 (!%p420_p2), %v1321_v1  ;;  %1219 = vmatprep.subr.bf16.mxu1 (!%p420_p2), %v1321_v1  ;;  %v1158_v5 = vld [vmem:[%s1543_s3] ss:$0 sm:$0xff] (!%p420_p2)  ;;  %s1323_s25 = smov (!%p420_p2), 112   ;;  %vm558_vm2 = vcmask (!%p420_p2), 130048   ;;  %vm605_vm3 = vcmask (!%p420_p2), 64512  }
   0x7   : > { %1212 = vmatpush3.bf16.msra.mxu0 (!%p420_p2), %v1287_v0  ;;  %1215 = vmatprep.mubr.msk.bf16.mxu0 (!%p420_p2), %vm1322_vm0, %v1321_v1  ;;  %s1324_s26 = smov (!%p420_p2), 96   ;;  %s1325_s27 = smov (!%p420_p2), 80   ;;  %vm623_vm4 = vcmask (!%p420_p2), 1043456   ;;  %v1289_v52 = vld [vmem:[%s1544_s4] sm:$0xff] (!%p420_p2)   ;;  %v1290_v53 = vld [vmem:[%s1544_s4 + $0x8] sm:$0xff] (!%p420_p2)   ;;  %vm1014_vm6 = vcmask (!%p420_p2), 523264  }
   0x8   : > { %1213 = vmatprep.subr.bf16.mxu0 (!%p420_p2), %v1321_v1  ;;  %1221 = vmatprep.mubr.msk.bf16.mxu1 (!%p420_p2), %vm1322_vm0, %v1321_v1  ;;  %s1326_s17 = smov (!%p420_p2), 64   ;;  %s1327_s18 = smov (!%p420_p2), 48  }
   0x9   : > { %s1328_s24 = smov (!%p420_p2), 16  }
   0xb   : > { %1214 = vmatpush3.bf16.msra.mxu0 (!%p420_p2), %v1288_v2  ;;  %v1167_v2 = vld [vmem:[%s1545_s5] ss:$0 sm:$0xff] (!%p420_p2) }
   0xc   : > { %1225 = vmatprep.subr.bf16.mxu0 (!%p420_p2), %v1321_v1 }
   0xd   : > { %s1556_s30 = smov (!%p466_p3, %s1151_s30), 1 }
   0xe   : > { %s1156_s19 = sshll.u32 %s1556_s30, 3  ;;  %s472_s16 = scalar_lea.vmem %s1541_s1, %s1556_s30 }
   0xf   : > { %s469_s22 = scalar_lea.vmem %s1540_s0, %s1156_s19  ;;  %v1162_v17 = vld [vmem:[%s472_s16] ss:$0 sm:$0xff] }
  0x10   : > { %v1434_v3 = vld [vmem:[%s469_s22] sm:$0xff] }
  0x11   : > { %v479_v4 = vpack.c.bf16 %v1434_v3, %v1434_v3 }
  0x13   : > { %1216 = vmatmul.mubr.msk.bf16.vlgmr.msra.gmra.mrb[0].mxu0 %vm504_vm1, %v479_v4 }
  0x14   : > { %1227 = vmatprep.mubr.msk.bf16.mxu0 %vm1322_vm0, %v1321_v1 }
  0xe6   : > { %v542_v6 = vpop.f32.mrb[0].mxu0 }
  0xe7   : > { %v543_v7 = vadd.f32 %v1158_v5, %v542_v6  ;;  %v1217_v8 = vpop.f32.mrb[1].mxu0 }
  0xe8   : > { %v545_v9 = vpop.f32.mrb[2].mxu0 }
  0xe9   : > { %v548_v10 = vpack.c.bf16 %v543_v7, %v543_v7  ;;  %v1218_v11 = vpop.f32.mrb[3].mxu0 }
  0xeb   : > { %667 = vrot.lane.b32.xlu1 %v548_v10, %s1323_s25  ;;  %556 = vrot.lane.b32.xlu0 %v548_v10, %s1324_s26 }
  0xef   : > { %669 = vrot.lane.b32.xlu0 %v548_v10, %s1325_s27  ;;  %s476_s27 = scalar_lea.vmem %s1554_s14, %s1156_s19 }
 0x15d   : > { %v557_v12 = vpop.permute.xlu0 %556  ;;  %v668_v16 = vpop.permute.xlu1 %667 }
 0x15e   : > { %v563_v13 = vsel %vm558_vm2, %v557_v12, 0 }
 0x15f   : > { %1220 = vmatpush3.bf16.xpose.msra.mxu1 %v563_v13 }
 0x160   : > { %1231 = vmatprep.subr.bf16.mxu1 %v1321_v1 }
 0x161   : > { %v670_v14 = vpop.permute.xlu0 %669 }
 0x162   : > { %v675_v15 = vsel %vm558_vm2, %v670_v14, 0 }
 0x166   : > { %1222 = vmatmul.mubr.msk.bf16.vlgmr.msra.gmra.mrb[0].mxu1 %vm558_vm2, %v548_v10 }
 0x167   : > { %1232 = vmatpush3.bf16.xpose.msra.mxu1 %v675_v15  ;;  %1233 = vmatprep.mubr.msk.bf16.mxu1 %vm1322_vm0, %v1321_v1 }
 0x168   : > { %1243 = vmatprep.subr.bf16.mxu1 %v1321_v1 }
 0x16e   : > { %1234 = vmatmul.mubr.msk.bf16.vlgmr.msra.gmra.mrb[4].mxu1 %vm558_vm2, %v668_v16  ;;  %v1291_v16 = vld [vmem:[%s1548_s8] sm:$0xff]  }
 0x16f   : > { %1247 = vmatprep.mubr.msk.bf16.mxu1 %vm1322_vm0, %v1321_v1  ;;  %1244 = vmatpush3.bf16.msra.mxu1 %v1289_v52 }
 0x170   : > { %1245 = vmatprep.subr.bf16.mxu1 %v1321_v1 }
 0x173   : > { %1246 = vmatpush3.bf16.msra.mxu1 %v1290_v53 }
 0x174   : > { %1259 = vmatprep.subr.bf16.mxu1 %v1321_v1 }
 0x239   : > { %v599_v18 = vpop.f32.mrb[0].mxu1 }
 0x23a   : > { %v600_v19 = vadd.f32 %v1162_v17, %v599_v18  ;;  %v1223_v20 = vpop.f32.mrb[1].mxu1 }
 0x23b   : > { %v602_v21 = vpop.f32.mrb[2].mxu1 }
 0x23c   : > { %v1224_v22 = vpop.f32.mrb[3].mxu1  ;;  %v606_v23 = vsel %vm605_vm3, %v600_v19, -inf  ;;  %v1171_v21 = vld [vmem:[%s1546_s6] ss:$0 sm:$0xff] }
 0x23d   : > { %607 = vmax.xlane.f32.xlu1 %v606_v23  ;;  %v1172_v23 = vld [vmem:[%s1547_s7] ss:$0 sm:$0xff] }
 0x241   : > { %v711_v24 = vpop.f32.mrb[4].mxu1 }
 0x242   : > { %v712_v25 = vadd.f32 %v1162_v17, %v711_v24  ;;  %v1235_v26 = vpop.f32.mrb[5].mxu1  ;;  %v1292_v17 = vld [vmem:[%s1548_s8 + $0x8] sm:$0xff]  }
 0x243   : > { %v714_v27 = vpop.f32.mrb[6].mxu1 }
 0x244   : > { %v1236_v28 = vpop.f32.mrb[7].mxu1  ;;  %v717_v29 = vsel %vm605_vm3, %v712_v25, -inf  ;;  %v1293_v27 = vld [vmem:[%s1550_s10] sm:$0xff]  }
 0x245   : > { %718 = vmax.xlane.f32.xlu0 %v717_v29  ;;  %v1294_v28 = vld [vmem:[%s1550_s10 + $0x8] sm:$0xff]   ;;  %v1295_v29 = vld [vmem:[%s1550_s10 + $0x10] sm:$0xff]  }
 0x2ca   : > { %v608_v30 = vpop.xlane.xlu1 %607 }
 0x2cb   : > { %v609_v31 = vsub.f32 %v600_v19, %v608_v30  ;;  %v1296_v30 = vld [vmem:[%s1550_s10 + $0x18] sm:$0xff]  }
 0x2cd   : > { %v610_v32 = vmul.f32 1.442695, %v609_v31  ;;  %v1173_v31 = vld [vmem:[%s1549_s9] ss:$0 sm:$0xff] }
 0x2cf   : > { %1297 = vpow2.f32 %v610_v32 }
 0x2d2   : > { %v719_v33 = vpop.xlane.xlu0 %718 }
 0x2d3   : > { %v720_v34 = vsub.f32 %v712_v25, %v719_v33 }
 0x2d5   : > { %v721_v35 = vmul.f32 1.442695, %v720_v34 }
 0x2d7   : > { %1299 = vpow2.f32 %v721_v35 }
 0x2d9   : > { %v1298_v36 = vpop.eup %1297 }
 0x2da   : > { %v612_v37 = vsel %vm605_vm3, %v1298_v36, 0.0 }
 0x2db   : > { %613 = vadd.xlane.f32.xlu0 %v612_v37 }
 0x2e1   : > { %v1300_v38 = vpop.eup %1299 }
 0x2e2   : > { %v723_v39 = vsel %vm605_vm3, %v1300_v38, 0.0 }
 0x2e3   : > { %724 = vadd.xlane.f32.xlu1 %v723_v39 }
 0x2f1   : > { %618 = vrot.lane.b32.xlu0 %v548_v10, %s1326_s17 }
 0x2f4   : > { %729 = vrot.lane.b32.xlu1 %v548_v10, %s1327_s18 }
 0x368   : > { %v614_v40 = vpop.xlane.xlu0 %613 }
 0x369   : > { %1301 = vrcp.f32 %v614_v40 }
 0x36c   : > { %v619_v41 = vpop.permute.xlu0 %618 }
 0x36d   : > { %v625_v42 = vsel %vm623_vm4, %v619_v41, 0 }
 0x36e   : > { %1226 = vmatpush3.bf16.msra.mxu0 %v625_v42 }
 0x36f   : > { %1237 = vmatprep.subr.bf16.mxu0 %v1321_v1 }
 0x370   : > { %v725_v43 = vpop.xlane.xlu1 %724 }
 0x371   : > { %1303 = vrcp.f32 %v725_v43 }
 0x373   : > { %v1302_v44 = vpop.eup %1301 }
 0x374   : > { %v616_v45 = vmul.f32 %v1302_v44, %v1298_v36  ;;  %v730_v46 = vpop.permute.xlu1 %729 }
 0x375   : > { %v735_v48 = vsel %vm623_vm4, %v730_v46, 0 }
 0x376   : > { %v617_v47 = vpack.c.bf16 %v616_v45, %v616_v45 }
 0x378   : > { %1228 = vmatmul.mubr.msk.bf16.vlgmr.msra.gmra.mrb[4].mxu0 %vm605_vm3, %v617_v47 }
 0x379   : > { %1238 = vmatpush3.bf16.msra.mxu0 %v735_v48  ;;  %1239 = vmatprep.mubr.msk.bf16.mxu0 %vm1322_vm0, %v1321_v1 }
 0x37a   : > { %1251 = vmatprep.subr.bf16.mxu0 %v1321_v1 }
 0x37b   : > { %v1304_v49 = vpop.eup %1303 }
 0x37c   : > { %v727_v50 = vmul.f32 %v1304_v49, %v1300_v38 }
 0x37e   : > { %v728_v51 = vpack.c.bf16 %v727_v50, %v727_v50 }
 0x380   : > { %1240 = vmatmul.mubr.msk.bf16.vlgmr.msra.gmra.mrb[8].mxu0 %vm605_vm3, %v728_v51 }
 0x381   : > { %1255 = vmatprep.mubr.msk.bf16.mxu0 %vm1322_vm0, %v1321_v1  ;;  %1252 = vmatpush3.bf16.msra.mxu0 %v1291_v16 }
 0x382   : > { %1253 = vmatprep.subr.bf16.mxu0 %v1321_v1 }
 0x385   : > { %1254 = vmatpush3.bf16.msra.mxu0 %v1292_v17  ;;  %v1185_v17 = vld [vmem:[%s1552_s12] ss:$0 sm:$0xff] }
 0x44b   : > { %v661_v54 = vpop.f32.mrb[4].mxu0 }
 0x44c   : > { %v1229_v55 = vpop.f32.mrb[5].mxu0 }
 0x44d   : > { %v664_v56 = vpop.f32.mrb[6].mxu0 }
 0x44e   : > { %v1230_v57 = vpop.f32.mrb[7].mxu0 }
 0x453   : > { %v771_v58 = vpop.f32.mrb[8].mxu0 }
 0x454   : > { %778 = vrot.lane.b32.xlu1 %v771_v58, %s1328_s24  ;;  %v1241_v59 = vpop.f32.mrb[9].mxu0 }
 0x455   : > { %v774_v60 = vpop.f32.mrb[10].mxu0 }
 0x456   : > { %v1242_v61 = vpop.f32.mrb[11].mxu0 }
 0x4c6   : > { %v779_v62 = vpop.permute.xlu1 %778 }
 0x4c7   : > { %v781_v63 = vsel %vm558_vm2, %v661_v54, %v779_v62  ;;  %v1179_v62 = vld [vmem:[%s1551_s11] ss:$0 sm:$0xff] }
 0x4c8   : > { %v782_v0 = vpack.c.bf16 %v781_v63, %v781_v63 }
 0x4ca   : > { %1248 = vmatmul.mubr.msk.bf16.vlgmr.msra.gmra.mrb[8].mxu1 %vm504_vm1, %v782_v0 }
 0x4cb   : > { %1267 = vmatprep.mubr.msk.bf16.mxu1 %vm1322_vm0, %v1321_v1  ;;  %1260 = vmatpush3.bf16.msra.mxu1 %v1293_v27 }
 0x4cc   : > { %1261 = vmatprep.subr.bf16.mxu1 %v1321_v1 }
 0x4cf   : > { %1262 = vmatpush3.bf16.msra.mxu1 %v1294_v28 }
 0x4d0   : > { %1263 = vmatprep.subr.bf16.mxu1 %v1321_v1 }
 0x4d3   : > { %1264 = vmatpush3.bf16.msra.mxu1 %v1295_v29 }
 0x4d4   : > { %1265 = vmatprep.subr.bf16.mxu1 %v1321_v1 }
 0x4d7   : > { %1266 = vmatpush3.bf16.msra.mxu1 %v1296_v30 }
 0x59d   : > { %v843_v4 = vpop.f32.mrb[8].mxu1 }
 0x59e   : > { %v844_v5 = vadd.f32 %v1167_v2, %v843_v4  ;;  %v1249_v6 = vpop.f32.mrb[9].mxu1 }
 0x59f   : > { %v846_v7 = vpop.f32.mrb[10].mxu1 }
 0x5a0   : > { %v1250_v8 = vpop.f32.mrb[11].mxu1  ;;  %v849_v9 = vadd.f32 %v844_v5, %v1434_v3 }
 0x5a2   : > { %v852_v10 = vsel %vm504_vm1, %v849_v9, 0.0 }
 0x5a3   : > { %853 = vadd.xlane.f32.xlu0 %v852_v10 }
 0x630   : > { %v854_v11 = vpop.xlane.xlu0 %853 }
 0x631   : > { %v856_v12 = vmul.f32 0.03125, %v854_v11 }
 0x633   : > { %v857_v13 = vsub.f32 %v849_v9, %v856_v12 }
 0x635   : > { %v858_v14 = vmul.f32 %v857_v13, %v857_v13 }
 0x637   : > { %v859_v15 = vsel %vm504_vm1, %v858_v14, 0.0 }
 0x638   : > { %860 = vadd.xlane.f32.xlu1 %v859_v15 }
 0x6c5   : > { %v861_v3 = vpop.xlane.xlu1 %860 }
 0x6c6   : > { %v862_v18 = vmul.f32 0.03125, %v861_v3 }
 0x6c8   : > { %v863_v19 = vadd.f32 1e-12, %v862_v18  ;;  %v1186_v18 = vld [vmem:[%s1553_s13] ss:$0 sm:$0xff] }
 0x6ca   : > { %1305 = vrsqrt.f32 %v863_v19 }
 0x6d4   : > { %v1306_v20 = vpop.eup %1305 }
 0x6d5   : > { %v865_v22 = vmul.f32 %v1306_v20, %v857_v13 }
 0x6d7   : > { %v872_v24 = vmul.f32 %v1171_v21, %v865_v22 }
 0x6d9   : > { %v879_v25 = vadd.f32 %v1172_v23, %v872_v24 }
 0x6db   : > { %v880_v26 = vpack.c.bf16 %v879_v25, %v879_v25 }
 0x6dd   : > { %1256 = vmatmul.mubr.msk.bf16.vlgmr.msra.gmra.mrb[12].mxu0 %vm504_vm1, %v880_v26 }
 0x7b0   : > { %v941_v32 = vpop.f32.mrb[12].mxu0 }
 0x7b1   : > { %v942_v33 = vadd.f32 %v1173_v31, %v941_v32  ;;  %v1257_v34 = vpop.f32.mrb[13].mxu0 }
 0x7b2   : > { %v944_v35 = vpop.f32.mrb[14].mxu0 }
 0x7b3   : > { %v947_v36 = vmul.f32 0.70710677, %v942_v33  ;;  %v1258_v37 = vpop.f32.mrb[15].mxu0  ;;  %v971_v58 = vmul.f32 0.5, %v942_v33 }
 0x7b5   : > { %v948_v38 = vand.u32 2147483647, %v947_v36  ;;  %vm968_vm5 = vcmp.ge.f32.partialorder %v947_v36, 0.0 }
 0x7b7   : > { %v949_v39 = vmul.f32 0.3275911, %v948_v38  ;;  %v962_v1 = vsub.f32 0.0, %v948_v38 }
 0x7b9   : > { %v950_v40 = vadd.f32 1.0, %v949_v39  ;;  %v963_v42 = vmul.f32 %v962_v1, %v948_v38 }
 0x7bb   : > { %1307 = vrcp.f32 %v950_v40  ;;  %v964_v45 = vmul.f32 1.442695, %v963_v42 }
 0x7bd   : > { %1309 = vpow2.f32 %v964_v45 }
 0x7c5   : > { %v1308_v41 = vpop.eup %1307 }
 0x7c6   : > { %v953_v43 = vmul.f32 1.0614054, %v1308_v41 }
 0x7c7   : > { %v1310_v53 = vpop.eup %1309 }
 0x7c8   : > { %v1177_v44 = vadd.f32 -1.4531521, %v953_v43 }
 0x7ca   : > { %v955_v46 = vmul.f32 %v1308_v41, %v1177_v44 }
 0x7cc   : > { %v956_v47 = vadd.f32 1.4214138, %v955_v46 }
 0x7ce   : > { %v957_v48 = vmul.f32 %v1308_v41, %v956_v47 }
 0x7d0   : > { %v1178_v49 = vadd.f32 -0.28449672, %v957_v48 }
 0x7d2   : > { %v959_v50 = vmul.f32 %v1308_v41, %v1178_v49 }
 0x7d4   : > { %v960_v51 = vadd.f32 0.2548296, %v959_v50 }
 0x7d6   : > { %v961_v52 = vmul.f32 %v1308_v41, %v960_v51 }
 0x7d8   : > { %v966_v54 = vmul.f32 %v1310_v53, %v961_v52 }
 0x7da   : > { %v967_v55 = vsub.f32 1.0, %v966_v54 }
 0x7dc   : > { %v969_v56 = vsub.f32 0.0, %v967_v55 }
 0x7de   : > { %v970_v57 = vsel %vm968_vm5, %v967_v55, %v969_v56 }
 0x7df   : > { %v972_v59 = vadd.f32 1.0, %v970_v57 }
 0x7e1   : > { %v973_v60 = vmul.f32 %v972_v59, %v971_v58 }
 0x7e3   : > { %v974_v61 = vpack.c.bf16 %v973_v60, %v973_v60 }
 0x7e5   : > { %1268 = vmatmul.mubr.msk.bf16.vlgmr.msra.gmra.mrb[12].mxu1 %vm1014_vm6, %v974_v61 }
 0x8b8   : > { %v1052_v63 = vpop.f32.mrb[12].mxu1 }
 0x8b9   : > { %v1053_v0 = vadd.f32 %v1179_v62, %v1052_v63  ;;  %v1269_v2 = vpop.f32.mrb[13].mxu1 }
 0x8ba   : > { %v1055_v4 = vpop.f32.mrb[14].mxu1 }
 0x8bb   : > { %v1270_v5 = vpop.f32.mrb[15].mxu1  ;;  %v1058_v6 = vadd.f32 %v1053_v0, %v879_v25 }
 0x8bd   : > { %v1061_v7 = vsel %vm504_vm1, %v1058_v6, 0.0 }
 0x8be   : > { %1062 = vadd.xlane.f32.xlu0 %v1061_v7 }
 0x94b   : > { %v1063_v8 = vpop.xlane.xlu0 %1062 }
 0x94c   : > { %v1064_v9 = vmul.f32 0.03125, %v1063_v8 }
 0x94e   : > { %v1065_v10 = vsub.f32 %v1058_v6, %v1064_v9 }
 0x950   : > { %v1066_v11 = vmul.f32 %v1065_v10, %v1065_v10 }
 0x952   : > { %v1067_v12 = vsel %vm504_vm1, %v1066_v11, 0.0 }
 0x953   : > { %1068 = vadd.xlane.f32.xlu0 %v1067_v12 }
 0x9e0   : > { %v1069_v13 = vpop.xlane.xlu0 %1068 }
 0x9e1   : > { %v1070_v14 = vmul.f32 0.03125, %v1069_v13 }
 0x9e3   : > { %v1071_v15 = vadd.f32 1e-12, %v1070_v14 }
 0x9e5   : > { %1311 = vrsqrt.f32 %v1071_v15 }
 0x9ef   : > { %v1312_v16 = vpop.eup %1311 }
 0x9f0   : > { %v1073_v3 = vmul.f32 %v1312_v16, %v1065_v10 }
 0x9f2   : > { %v1080_v19 = vmul.f32 %v1185_v17, %v1073_v3 }
 0x9f4   : > { %v1087_v20 = vadd.f32 %v1186_v18, %v1080_v19 }
 0x9f6   : > { %1088 = vst.msk [vmem:[%s476_s27] sm:$0xff] %vm504_vm1, %v1087_v20 }
 0x9f7 PF: > { %s24_s29 = sadd.s32 1, %s1319_s29  }
 0x9f8   : > { %p21_p4 = scmp.ge.s32.totalorder %s24_s29, 4  }
 0x9fa   :  { %23 = sbr.rel (!%p21_p4) target bundleno = 1 (0x1), region = 109 }

// kernel: bert_finetune_forward.3
= control target key start
LH: loop header
LB: loop body
LE: loop exit
PB: predicated region body
PF: predicated region fallthrough
CT: control target
= control target key end

     0   :  { %s1501_s21 = smov 0   ;;  %s1645_s0 = inlined_call_operand.vmem [shape: f32[16,32], index: 0, kind: input, shape index: {}]   ;;  %s1646_s1 = inlined_call_operand.vmem [shape: f32[2,1,8], index: 1, kind: input, shape index: {}]   ;;  %s1647_s2 = inlined_call_operand.vmem [shape: f32[1,32], index: 2, kind: input, shape index: {}]   ;;  %s1648_s3 = inlined_call_operand.vmem [shape: f32[1,32], index: 3, kind: input, shape index: {}]   ;;  %s1649_s4 = inlined_call_operand.vmem [shape: bf16[32,96], index: 4, kind: input, shape index: {}]   ;;  %s1650_s5 = inlined_call_operand.vmem [shape: f32[1,96], index: 5, kind: input, shape index: {}]   ;;  %s1651_s6 = inlined_call_operand.vmem [shape: bf16[32,32], index: 6, kind: input, shape index: {}]   ;;  %s1652_s7 = inlined_call_operand.vmem [shape: f32[1,32], index: 7, kind: input, shape index: {}]   ;;  %s1653_s8 = inlined_call_operand.vmem [shape: f32[1,32], index: 8, kind: input, shape index: {}]   ;;  %s1654_s9 = inlined_call_operand.vmem [shape: f32[1,32], index: 9, kind: input, shape index: {}]   ;;  %s1655_s10 = inlined_call_operand.vmem [shape: bf16[32,64], index: 10, kind: input, shape index: {}]   ;;  %s1656_s11 = inlined_call_operand.vmem [shape: f32[1,64], index: 11, kind: input, shape index: {}]   ;;  %s1657_s12 = inlined_call_operand.vmem [shape: bf16[64,32], index: 12, kind: input, shape index: {}]   ;;  %s1658_s13 = inlined_call_operand.vmem [shape: f32[1,32], index: 13, kind: input, shape index: {}]   ;;  %s1659_s14 = inlined_call_operand.vmem [shape: f32[1,32], index: 14, kind: input, shape index: {}]   ;;  %s1660_s15 = inlined_call_operand.vmem [shape: f32[1,32], index: 15, kind: input, shape index: {}]   ;;  %s1661_s16 = inlined_call_operand.vmem [shape: f32[16,32], index: 16, kind: output, shape index: {}]  }
   0x1   :  { %1662 = sst [smem:[#allocation2_spill]] %s1645_s0 }
   0x2 LB: > { %s1234_s22 = sadd.s32 4294967295, %s1406_s21   ;;  %p1238_p0 = scmp.ge.s32.totalorder %s1406_s21, 1  ;;  %s1406_s21 = sphi %s1501_s21, %s26_s21  }
   0x3   : > { %p469_p1 = scmp.lt.s32.totalorder %s1406_s21, 3 }
   0x5   : > { %p470_p2 = pnand %p1238_p0, %p469_p1 }
   0x6   : > { %p520_p3 = scmp.lt.s32.totalorder (!%p470_p2), %s1234_s22, 1  ;;  %vm535_vm0 = vcmask (!%p470_p2), 261120   ;;  %s1663_s26 = sld [smem:[#allocation2_spill]] (!%p470_p2)  ;;  %v1372_v7 = vld [vmem:[%s1649_s4] sm:$0xff] (!%p470_p2)   ;;  %v1408_v8 = vmov (!%p470_p2), 0.0   ;;  %v1373_v9 = vld [vmem:[%s1649_s4 + $0x8] sm:$0xff] (!%p470_p2)  }
   0x7   : > { %473 = sbr.rel (%p470_p2) target bundleno = 2866 (0xb32), region = 84  ;;  %1296 = vmatprep.subr.bf16.mxu0 (!%p470_p2), %v1408_v8  ;;  %1304 = vmatprep.subr.bf16.mxu1 (!%p470_p2), %v1408_v8  ;;  %vm1409_vm1 = vmmov (!%p470_p2), 0   ;;  %v1241_v14 = vld [vmem:[%s1647_s2] ss:$0 sm:$0xff] (!%p470_p2)  ;;  %s1412_s28 = smov (!%p470_p2), 80   ;;  %vm642_vm2 = vcmask (!%p470_p2), 130048  }
   0x8   : > { %1297 = vmatpush3.bf16.msra.mxu0 (!%p470_p2), %v1372_v7  ;;  %1300 = vmatprep.mubr.msk.bf16.mxu0 (!%p470_p2), %vm1409_vm1, %v1408_v8  ;;  %v1242_v16 = vld [vmem:[%s1648_s3] ss:$0 sm:$0xff] (!%p470_p2)  ;;  %vm689_vm3 = vcmask (!%p470_p2), 64512   ;;  %s1413_s17 = smov (!%p470_p2), 48   ;;  %s1414_s18 = smov (!%p470_p2), 64   ;;  %vm707_vm4 = vcmask (!%p470_p2), 1043456  }
   0x9   : > { %1298 = vmatprep.subr.bf16.mxu0 (!%p470_p2), %v1408_v8  ;;  %1306 = vmatprep.mubr.msk.bf16.mxu1 (!%p470_p2), %vm1409_vm1, %v1408_v8  ;;  %v1243_v20 = vld [vmem:[%s1650_s5] ss:$0 sm:$0xff] (!%p470_p2)  ;;  %vm1097_vm6 = vcmask (!%p470_p2), 523264  }
   0xc   : > { %1299 = vmatpush3.bf16.msra.mxu0 (!%p470_p2), %v1373_v9 }
   0xd   : > { %1310 = vmatprep.subr.bf16.mxu0 (!%p470_p2), %v1408_v8 }
   0xe   : > { %s1665_s22 = smov (!%p520_p3, %s1234_s22), 1 }
   0xf   : > { %s1239_s23 = sshll.u32 %s1665_s22, 3  ;;  %s526_s0 = scalar_lea.vmem %s1646_s1, %s1665_s22 }
  0x10   : > { %s523_s27 = scalar_lea.vmem %s1663_s26, %s1239_s23  ;;  %s1410_s26 = smov 112   ;;  %v1247_v32 = vld [vmem:[%s526_s0] ss:$0 sm:$0xff] }
  0x11   : > { %v532_v0 = vld [vmem:[%s523_s27] sm:$0xff]  ;;  %s1411_s27 = smov 96   ;;  %s530_s0 = scalar_lea.vmem %s1661_s16, %s1239_s23 }
  0x12   : > { %v536_v1 = vsel %vm535_vm0, %v532_v0, 0.0 }
  0x13   : > { %537 = vadd.xlane.f32.xlu0 %v536_v1 }
  0xa0   : > { %v538_v2 = vpop.xlane.xlu0 %537 }
  0xa1   : > { %v540_v3 = vmul.f32 0.03125, %v538_v2 }
  0xa3   : > { %v541_v4 = vsub.f32 %v532_v0, %v540_v3  ;;  %v1374_v3 = vld [vmem:[%s1651_s6] sm:$0xff]  }
  0xa5   : > { %v542_v5 = vmul.f32 %v541_v4, %v541_v4 }
  0xa7   : > { %v543_v6 = vsel %vm535_vm0, %v542_v5, 0.0 }
  0xa8   : > { %544 = vadd.xlane.f32.xlu0 %v543_v6 }
 0x135   : > { %v545_v10 = vpop.xlane.xlu0 %544 }
 0x136   : > { %v546_v11 = vmul.f32 0.03125, %v545_v10 }
 0x138   : > { %v547_v12 = vadd.f32 1e-12, %v546_v11 }
 0x13a   : > { %1382 = vrsqrt.f32 %v547_v12 }
 0x144   : > { %v1383_v13 = vpop.eup %1382 }
 0x145   : > { %v549_v15 = vmul.f32 %v1383_v13, %v541_v4  ;;  %v1375_v4 = vld [vmem:[%s1651_s6 + $0x8] sm:$0xff]  }
 0x147   : > { %v556_v17 = vmul.f32 %v1241_v14, %v549_v15 }
 0x149   : > { %v1539_v18 = vadd.f32 %v1242_v16, %v556_v17  ;;  %v1252_v17 = vld [vmem:[%s1652_s7] ss:$0 sm:$0xff] }
 0x14b   : > { %v564_v19 = vpack.c.bf16 %v1539_v18, %v1539_v18 }
 0x14d   : > { %1301 = vmatmul.mubr.msk.bf16.vlgmr.msra.gmra.mrb[0].mxu0 %vm535_vm0, %v564_v19 }
 0x14e   : > { %1312 = vmatprep.mubr.msk.bf16.mxu0 %vm1409_vm1, %v1408_v8 }
 0x220   : > { %v626_v21 = vpop.f32.mrb[0].mxu0 }
 0x221   : > { %v627_v22 = vadd.f32 %v1243_v20, %v626_v21  ;;  %v1302_v23 = vpop.f32.mrb[1].mxu0 }
 0x222   : > { %v629_v24 = vpop.f32.mrb[2].mxu0 }
 0x223   : > { %v632_v25 = vpack.c.bf16 %v627_v22, %v627_v22  ;;  %v1303_v26 = vpop.f32.mrb[3].mxu0 }
 0x225   : > { %751 = vrot.lane.b32.xlu0 %v632_v25, %s1410_s26  ;;  %640 = vrot.lane.b32.xlu1 %v632_v25, %s1411_s27  ;;  %s1415_s26 = smov 16  }
 0x229   : > { %753 = vrot.lane.b32.xlu1 %v632_v25, %s1412_s28 }
 0x297   : > { %v641_v27 = vpop.permute.xlu1 %640  ;;  %v752_v31 = vpop.permute.xlu0 %751 }
 0x298   : > { %v647_v28 = vsel %vm642_vm2, %v641_v27, 0 }
 0x299   : > { %1305 = vmatpush3.bf16.xpose.msra.mxu1 %v647_v28 }
 0x29a   : > { %1316 = vmatprep.subr.bf16.mxu1 %v1408_v8 }
 0x29b   : > { %v754_v29 = vpop.permute.xlu1 %753 }
 0x29c   : > { %v759_v30 = vsel %vm642_vm2, %v754_v29, 0 }
 0x2a0   : > { %1307 = vmatmul.mubr.msk.bf16.vlgmr.msra.gmra.mrb[0].mxu1 %vm642_vm2, %v632_v25 }
 0x2a1   : > { %1317 = vmatpush3.bf16.xpose.msra.mxu1 %v759_v30  ;;  %1318 = vmatprep.mubr.msk.bf16.mxu1 %vm1409_vm1, %v1408_v8 }
 0x2a2   : > { %1328 = vmatprep.subr.bf16.mxu1 %v1408_v8 }
 0x2a8   : > { %1319 = vmatmul.mubr.msk.bf16.vlgmr.msra.gmra.mrb[4].mxu1 %vm642_vm2, %v752_v31  ;;  %v1376_v31 = vld [vmem:[%s1655_s10] sm:$0xff]  }
 0x2a9   : > { %1332 = vmatprep.mubr.msk.bf16.mxu1 %vm1409_vm1, %v1408_v8  ;;  %1329 = vmatpush3.bf16.msra.mxu1 %v1374_v3 }
 0x2aa   : > { %1330 = vmatprep.subr.bf16.mxu1 %v1408_v8 }
 0x2ad   : > { %1331 = vmatpush3.bf16.msra.mxu1 %v1375_v4 }
 0x2ae   : > { %1344 = vmatprep.subr.bf16.mxu1 %v1408_v8 }
 0x373   : > { %v683_v33 = vpop.f32.mrb[0].mxu1 }
 0x374   : > { %v684_v34 = vadd.f32 %v1247_v32, %v683_v33  ;;  %v1308_v35 = vpop.f32.mrb[1].mxu1 }
 0x375   : > { %v686_v36 = vpop.f32.mrb[2].mxu1 }
 0x376   : > { %v1309_v37 = vpop.f32.mrb[3].mxu1  ;;  %v690_v38 = vsel %vm689_vm3, %v684_v34, -inf  ;;  %v1256_v36 = vld [vmem:[%s1653_s8] ss:$0 sm:$0xff] }
 0x377   : > { %691 = vmax.xlane.f32.xlu1 %v690_v38  ;;  %v1257_v38 = vld [vmem:[%s1654_s9] ss:$0 sm:$0xff] }
 0x37b   : > { %v795_v39 = vpop.f32.mrb[4].mxu1 }
 0x37c   : > { %v796_v40 = vadd.f32 %v1247_v32, %v795_v39  ;;  %v1320_v41 = vpop.f32.mrb[5].mxu1 }
 0x37d   : > { %v798_v42 = vpop.f32.mrb[6].mxu1 }
 0x37e   : > { %v1321_v43 = vpop.f32.mrb[7].mxu1  ;;  %v801_v44 = vsel %vm689_vm3, %v796_v40, -inf  ;;  %v1378_v42 = vld [vmem:[%s1657_s12] sm:$0xff]  }
 0x37f   : > { %802 = vmax.xlane.f32.xlu0 %v801_v44  ;;  %v1379_v43 = vld [vmem:[%s1657_s12 + $0x8] sm:$0xff]   ;;  %v1380_v44 = vld [vmem:[%s1657_s12 + $0x10] sm:$0xff]  }
 0x395   : > { %813 = vrot.lane.b32.xlu0 %v632_v25, %s1413_s17 }
 0x404   : > { %v692_v45 = vpop.xlane.xlu1 %691 }
 0x405   : > { %v693_v46 = vsub.f32 %v684_v34, %v692_v45  ;;  %v1381_v45 = vld [vmem:[%s1657_s12 + $0x18] sm:$0xff]  }
 0x407   : > { %v694_v47 = vmul.f32 1.442695, %v693_v46  ;;  %v1258_v46 = vld [vmem:[%s1656_s11] ss:$0 sm:$0xff] }
 0x409   : > { %1384 = vpow2.f32 %v694_v47 }
 0x40c   : > { %v803_v48 = vpop.xlane.xlu0 %802 }
 0x40d   : > { %v804_v49 = vsub.f32 %v796_v40, %v803_v48 }
 0x40f   : > { %v805_v50 = vmul.f32 1.442695, %v804_v49 }
 0x410   : > { %v814_v61 = vpop.permute.xlu0 %813 }
 0x411   : > { %1386 = vpow2.f32 %v805_v50  ;;  %v819_v63 = vsel %vm707_vm4, %v814_v61, 0 }
 0x413   : > { %v1385_v51 = vpop.eup %1384 }
 0x414   : > { %v696_v52 = vsel %vm689_vm3, %v1385_v51, 0.0 }
 0x415   : > { %697 = vadd.xlane.f32.xlu1 %v696_v52 }
 0x41b   : > { %v1387_v53 = vpop.eup %1386 }
 0x41c   : > { %v807_v54 = vsel %vm689_vm3, %v1387_v53, 0.0 }
 0x41d   : > { %808 = vadd.xlane.f32.xlu1 %v807_v54 }
 0x42e   : > { %702 = vrot.lane.b32.xlu1 %v632_v25, %s1414_s18 }
 0x4a2   : > { %v698_v55 = vpop.xlane.xlu1 %697 }
 0x4a3   : > { %1388 = vrcp.f32 %v698_v55 }
 0x4aa   : > { %v809_v56 = vpop.xlane.xlu1 %808 }
 0x4ab   : > { %1390 = vrcp.f32 %v809_v56 }
 0x4ad   : > { %v1389_v57 = vpop.eup %1388 }
 0x4ae   : > { %v700_v58 = vmul.f32 %v1389_v57, %v1385_v51  ;;  %v703_v59 = vpop.permute.xlu1 %702 }
 0x4af   : > { %v709_v60 = vsel %vm707_vm4, %v703_v59, 0 }
 0x4b0   : > { %1311 = vmatpush3.bf16.msra.mxu0 %v709_v60  ;;  %v701_v62 = vpack.c.bf16 %v700_v58, %v700_v58 }
 0x4b1   : > { %1322 = vmatprep.subr.bf16.mxu0 %v1408_v8 }
 0x4b3   : > { %1313 = vmatmul.mubr.msk.bf16.vlgmr.msra.gmra.mrb[4].mxu0 %vm689_vm3, %v701_v62 }
 0x4b4   : > { %1323 = vmatpush3.bf16.msra.mxu0 %v819_v63  ;;  %1324 = vmatprep.mubr.msk.bf16.mxu0 %vm1409_vm1, %v1408_v8 }
 0x4b5   : > { %v1391_v0 = vpop.eup %1390  ;;  %1336 = vmatprep.subr.bf16.mxu0 %v1408_v8 }
 0x4b6   : > { %v811_v1 = vmul.f32 %v1391_v0, %v1387_v53 }
 0x4b8   : > { %v812_v2 = vpack.c.bf16 %v811_v1, %v811_v1 }
 0x4bb   : > { %1325 = vmatmul.mubr.msk.bf16.vlgmr.msra.gmra.mrb[8].mxu0 %vm689_vm3, %v812_v2 }
 0x4bc   : > { %1340 = vmatprep.mubr.msk.bf16.mxu0 %vm1409_vm1, %v1408_v8  ;;  %1337 = vmatpush3.bf16.msra.mxu0 %v1376_v31 }
 0x4bd   : > { %1338 = vmatprep.subr.bf16.mxu0 %v1408_v8 }
 0x586   : > { %v745_v5 = vpop.f32.mrb[4].mxu0 }
 0x587   : > { %v1314_v6 = vpop.f32.mrb[5].mxu0 }
 0x588   : > { %v748_v7 = vpop.f32.mrb[6].mxu0 }
 0x589   : > { %v1315_v9 = vpop.f32.mrb[7].mxu0 }
 0x58e   : > { %v855_v10 = vpop.f32.mrb[8].mxu0 }
 0x58f   : > { %862 = vrot.lane.b32.xlu1 %v855_v10, %s1415_s26  ;;  %v1326_v11 = vpop.f32.mrb[9].mxu0 }
 0x590   : > { %v858_v12 = vpop.f32.mrb[10].mxu0 }
 0x591   : > { %v1327_v13 = vpop.f32.mrb[11].mxu0 }
 0x601   : > { %v863_v14 = vpop.permute.xlu1 %862 }
 0x602   : > { %v865_v15 = vsel %vm642_vm2, %v745_v5, %v863_v14  ;;  %v1264_v14 = vld [vmem:[%s1658_s13] ss:$0 sm:$0xff] }
 0x603   : > { %v866_v16 = vpack.c.bf16 %v865_v15, %v865_v15 }
 0x605   : > { %1333 = vmatmul.mubr.msk.bf16.vlgmr.msra.gmra.mrb[8].mxu1 %vm535_vm0, %v866_v16 }
 0x606   : > { %1352 = vmatprep.mubr.msk.bf16.mxu1 %vm1409_vm1, %v1408_v8  ;;  %1345 = vmatpush3.bf16.msra.mxu1 %v1378_v42 }
 0x607   : > { %1346 = vmatprep.subr.bf16.mxu1 %v1408_v8 }
 0x60a   : > { %1347 = vmatpush3.bf16.msra.mxu1 %v1379_v43 }
 0x60b   : > { %1348 = vmatprep.subr.bf16.mxu1 %v1408_v8 }
 0x60e   : > { %1349 = vmatpush3.bf16.msra.mxu1 %v1380_v44 }
 0x60f   : > { %1350 = vmatprep.subr.bf16.mxu1 %v1408_v8 }
 0x612   : > { %1351 = vmatpush3.bf16.msra.mxu1 %v1381_v45 }
 0x6d8   : > { %v927_v19 = vpop.f32.mrb[8].mxu1 }
 0x6d9   : > { %v928_v20 = vadd.f32 %v1252_v17, %v927_v19  ;;  %v1334_v21 = vpop.f32.mrb[9].mxu1 }
 0x6da   : > { %v930_v22 = vpop.f32.mrb[10].mxu1 }
 0x6db   : > { %v1335_v23 = vpop.f32.mrb[11].mxu1  ;;  %v933_v24 = vadd.f32 %v928_v20, %v1539_v18  ;;  %v1377_v18 = vld [vmem:[%s1655_s10 + $0x8] sm:$0xff]  }
 0x6dc   : > { %1339 = vmatpush3.bf16.msra.mxu0 %v1377_v18  ;;  %v1270_v18 = vld [vmem:[%s1659_s14] ss:$0 sm:$0xff] }
 0x6dd   : > { %v936_v25 = vsel %vm535_vm0, %v933_v24, 0.0 }
 0x6de   : > { %937 = vadd.xlane.f32.xlu1 %v936_v25 }
 0x76b   : > { %v938_v26 = vpop.xlane.xlu1 %937 }
 0x76c   : > { %v939_v27 = vmul.f32 0.03125, %v938_v26 }
 0x76e   : > { %v940_v28 = vsub.f32 %v933_v24, %v939_v27 }
 0x770   : > { %v941_v29 = vmul.f32 %v940_v28, %v940_v28 }
 0x772   : > { %v942_v30 = vsel %vm535_vm0, %v941_v29, 0.0 }
 0x773   : > { %943 = vadd.xlane.f32.xlu0 %v942_v30 }
 0x800   : > { %v944_v32 = vpop.xlane.xlu0 %943 }
 0x801   : > { %v945_v33 = vmul.f32 0.03125, %v944_v32 }
 0x803   : > { %v946_v34 = vadd.f32 1e-12, %v945_v33  ;;  %v1271_v33 = vld [vmem:[%s1660_s15] ss:$0 sm:$0xff] }
 0x805   : > { %1392 = vrsqrt.f32 %v946_v34 }
 0x80f   : > { %v1393_v35 = vpop.eup %1392 }
 0x810   : > { %v948_v37 = vmul.f32 %v1393_v35, %v940_v28 }
 0x812   : > { %v955_v39 = vmul.f32 %v1256_v36, %v948_v37 }
 0x814   : > { %v962_v40 = vadd.f32 %v1257_v38, %v955_v39 }
 0x816   : > { %v963_v41 = vpack.c.bf16 %v962_v40, %v962_v40 }
 0x818   : > { %1341 = vmatmul.mubr.msk.bf16.vlgmr.msra.gmra.mrb[12].mxu0 %vm535_vm0, %v963_v41 }
 0x8eb   : > { %v1024_v47 = vpop.f32.mrb[12].mxu0 }
 0x8ec   : > { %v1025_v48 = vadd.f32 %v1258_v46, %v1024_v47  ;;  %v1342_v49 = vpop.f32.mrb[13].mxu0 }
 0x8ed   : > { %v1027_v50 = vpop.f32.mrb[14].mxu0 }
 0x8ee   : > { %v1030_v51 = vmul.f32 0.70710677, %v1025_v48  ;;  %v1343_v52 = vpop.f32.mrb[15].mxu0  ;;  %v1054_v10 = vmul.f32 0.5, %v1025_v48 }
 0x8f0   : > { %v1031_v53 = vand.u32 2147483647, %v1030_v51  ;;  %vm1051_vm5 = vcmp.ge.f32.partialorder %v1030_v51, 0.0 }
 0x8f2   : > { %v1032_v54 = vmul.f32 0.3275911, %v1031_v53  ;;  %v1045_v8 = vsub.f32 0.0, %v1031_v53 }
 0x8f4   : > { %v1033_v55 = vadd.f32 1.0, %v1032_v54  ;;  %v1046_v57 = vmul.f32 %v1045_v8, %v1031_v53 }
 0x8f6   : > { %1394 = vrcp.f32 %v1033_v55  ;;  %v1047_v60 = vmul.f32 1.442695, %v1046_v57 }
 0x8f8   : > { %1396 = vpow2.f32 %v1047_v60 }
 0x900   : > { %v1395_v56 = vpop.eup %1394 }
 0x901   : > { %v1036_v58 = vmul.f32 1.0614054, %v1395_v56 }
 0x902   : > { %v1397_v4 = vpop.eup %1396 }
 0x903   : > { %v1262_v59 = vadd.f32 -1.4531521, %v1036_v58 }
 0x905   : > { %v1038_v61 = vmul.f32 %v1395_v56, %v1262_v59 }
 0x907   : > { %v1039_v62 = vadd.f32 1.4214138, %v1038_v61 }
 0x909   : > { %v1040_v63 = vmul.f32 %v1395_v56, %v1039_v62 }
 0x90b   : > { %v1263_v0 = vadd.f32 -0.28449672, %v1040_v63 }
 0x90d   : > { %v1042_v1 = vmul.f32 %v1395_v56, %v1263_v0 }
 0x90f   : > { %v1043_v2 = vadd.f32 0.2548296, %v1042_v1 }
 0x911   : > { %v1044_v3 = vmul.f32 %v1395_v56, %v1043_v2 }
 0x913   : > { %v1049_v5 = vmul.f32 %v1397_v4, %v1044_v3 }
 0x915   : > { %v1050_v6 = vsub.f32 1.0, %v1049_v5 }
 0x917   : > { %v1052_v7 = vsub.f32 0.0, %v1050_v6 }
 0x919   : > { %v1053_v9 = vsel %vm1051_vm5, %v1050_v6, %v1052_v7 }
 0x91a   : > { %v1055_v11 = vadd.f32 1.0, %v1053_v9 }
 0x91c   : > { %v1056_v12 = vmul.f32 %v1055_v11, %v1054_v10 }
 0x91e   : > { %v1057_v13 = vpack.c.bf16 %v1056_v12, %v1056_v12 }
 0x920   : > { %1353 = vmatmul.mubr.msk.bf16.vlgmr.msra.gmra.mrb[12].mxu1 %vm1097_vm6, %v1057_v13 }
 0x9f3   : > { %v1135_v15 = vpop.f32.mrb[12].mxu1 }
 0x9f4   : > { %v1136_v16 = vadd.f32 %v1264_v14, %v1135_v15  ;;  %v1354_v17 = vpop.f32.mrb[13].mxu1 }
 0x9f5   : > { %v1138_v19 = vpop.f32.mrb[14].mxu1 }
 0x9f6   : > { %v1355_v20 = vpop.f32.mrb[15].mxu1  ;;  %v1141_v21 = vadd.f32 %v1136_v16, %v962_v40 }
 0x9f8   : > { %v1144_v22 = vsel %vm535_vm0, %v1141_v21, 0.0 }
 0x9f9   : > { %1145 = vadd.xlane.f32.xlu1 %v1144_v22 }
 0xa86   : > { %v1146_v23 = vpop.xlane.xlu1 %1145 }
 0xa87   : > { %v1147_v24 = vmul.f32 0.03125, %v1146_v23 }
 0xa89   : > { %v1148_v25 = vsub.f32 %v1141_v21, %v1147_v24 }
 0xa8b   : > { %v1149_v26 = vmul.f32 %v1148_v25, %v1148_v25 }
 0xa8d   : > { %v1150_v27 = vsel %vm535_vm0, %v1149_v26, 0.0 }
 0xa8e   : > { %1151 = vadd.xlane.f32.xlu1 %v1150_v27 }
 0xb1b   : > { %v1152_v28 = vpop.xlane.xlu1 %1151 }
 0xb1c   : > { %v1153_v29 = vmul.f32 0.03125, %v1152_v28 }
 0xb1e   : > { %v1154_v30 = vadd.f32 1e-12, %v1153_v29 }
 0xb20   : > { %1398 = vrsqrt.f32 %v1154_v30 }
 0xb2a   : > { %v1399_v31 = vpop.eup %1398 }
 0xb2b   : > { %v1156_v32 = vmul.f32 %v1399_v31, %v1148_v25 }
 0xb2d   : > { %v1163_v34 = vmul.f32 %v1270_v18, %v1156_v32 }
 0xb2f   : > { %v1170_v35 = vadd.f32 %v1271_v33, %v1163_v34 }
 0xb31   : > { %1171 = vst.msk [vmem:[%s530_s0] sm:$0xff] %vm535_vm0, %v1170_v35 }
 0xb32 PF: > { %s26_s21 = sadd.s32 1, %s1406_s21  }
 0xb33   : > { %p23_p4 = scmp.ge.s32.totalorder %s26_s21, 4  }
 0xb35   :  { %25 = sbr.rel (!%p23_p4) target bundleno = 2 (0x2), region = 117 }

</bundles_post_ra>
